<compile_context>
chip_gen: v6e
topology: v6e:2x2x1
jax: 0.10.0
libtpu: 0.0.40
codegen_flags: <defaults>
</compile_context>

<pallas_src>
import math
from functools import partial

import jax
import jax.numpy as jnp
from jax.experimental import pallas as pl
from jax.experimental.pallas import tpu as pltpu

# Feed the MXU bf16 (v6e/v7x fast path); accumulation stays f32.
_MXU_DTYPE = jnp.bfloat16
_VMEM_LIMIT = 64 * 1024 * 1024


def _pick_tile(dim, pref, align):
    """Largest legal block extent <= pref for `dim`.

    Legal = equals the full dim, or is a multiple of `align` (8 for the
    second-minor axis, 128 for the minor axis) that divides `dim` evenly.
    """
    if dim <= pref:
        return dim
    t = (pref // align) * align
    while t >= align:
        if dim % t == 0:
            return t
        t -= align
    return dim  # fall back to the full extent (always legal)


# ---------------- Pallas kernels ----------------

def _matmul_bias_kernel(x_ref, w_ref, b_ref, o_ref, acc_ref, *, relu):
    """out = relu?(x @ w + b), K-tiled with f32 accumulator."""
    k = pl.program_id(2)

    @pl.when(k == 0)
    def _():
        acc_ref[...] = jnp.zeros_like(acc_ref)

    acc_ref[...] += jnp.dot(
        x_ref[...].astype(_MXU_DTYPE),
        w_ref[...].astype(_MXU_DTYPE),
        preferred_element_type=jnp.float32,
    )

    @pl.when(k == pl.num_programs(2) - 1)
    def _():
        y = acc_ref[...] + b_ref[...]
        if relu:
            y = jnp.maximum(y, 0.0)
        o_ref[...] = y.astype(o_ref.dtype)


def _matmul_res_ln_kernel(x_ref, w_ref, b_ref, r_ref, g_ref, bt_ref,
                          o_ref, acc_ref, *, eps):
    """out = LayerNorm((x @ w + b) + residual) * gamma + beta.

    The residual add + LayerNorm epilogue is fused into the final K step, so
    the (B*S, D) activation never takes an extra HBM round trip.
    """
    k = pl.program_id(1)

    @pl.when(k == 0)
    def _():
        acc_ref[...] = jnp.zeros_like(acc_ref)

    acc_ref[...] += jnp.dot(
        x_ref[...].astype(_MXU_DTYPE),
        w_ref[...].astype(_MXU_DTYPE),
        preferred_element_type=jnp.float32,
    )

    @pl.when(k == pl.num_programs(1) - 1)
    def _():
        y = acc_ref[...] + b_ref[...] + r_ref[...].astype(jnp.float32)
        mean = jnp.mean(y, axis=-1, keepdims=True)
        var = jnp.mean(jnp.square(y - mean), axis=-1, keepdims=True)
        yn = (y - mean) * jax.lax.rsqrt(var + eps)
        o_ref[...] = (yn * g_ref[...] + bt_ref[...]).astype(o_ref.dtype)


def _attention_kernel(q_ref, k_ref, o_ref, *, scale):
    """One batch per grid step; all heads processed together (batched dots).

    V == Q in the reference module, so q is reused as the value tensor.
    """
    q = q_ref[0]                          # (H, S, d_k) f32
    kk = k_ref[0]                         # (H, S, d_k) f32
    q_bf = q.astype(_MXU_DTYPE)
    k_bf = kk.astype(_MXU_DTYPE)

    # scores[h, i, j] = sum_d q[h,i,d] * k[h,j,d]  -- no materialized K^T
    scores = jnp.einsum(
        "hqd,hkd->hqk", q_bf, k_bf, preferred_element_type=jnp.float32
    ) * scale                             # (H, S, S), f32

    m = jnp.max(scores, axis=-1, keepdims=True)
    p = jnp.exp(scores - m)
    denom = jnp.sum(p, axis=-1, keepdims=True)
    p = p * pl.reciprocal(denom, approx=True)   # divide on the EUP slot

    # V == Q (reference applies W_Q to V); contract over the key axis.
    ctx = jnp.einsum(
        "hqk,hkd->hqd", p.astype(_MXU_DTYPE), q_bf,
        preferred_element_type=jnp.float32,
    )                                      # (H, S, d_k)
    o_ref[0] = ctx.astype(o_ref.dtype)


# ---------------- pallas_call wrappers ----------------

def pallas_matmul_bias(x, w, b=None, relu=False, tm=256, tn=256, tk=512):
    M, K = x.shape
    _, N = w.shape
    if b is None:
        b = jnp.zeros((N,), x.dtype)
    tm = _pick_tile(M, tm, 8)
    tn = _pick_tile(N, tn, 128)
    tk = _pick_tile(K, tk, 128)
    grid = (M // tm, N // tn, K // tk)
    return pl.pallas_call(
        partial(_matmul_bias_kernel, relu=relu),
        out_shape=jax.ShapeDtypeStruct((M, N), x.dtype),
        grid_spec=pltpu.PrefetchScalarGridSpec(
            num_scalar_prefetch=0,
            grid=grid,
            in_specs=[
                pl.BlockSpec((tm, tk), lambda i, j, k: (i, k)),
                pl.BlockSpec((tk, tn), lambda i, j, k: (k, j)),
                pl.BlockSpec((1, tn), lambda i, j, k: (0, j)),
            ],
            out_specs=pl.BlockSpec((tm, tn), lambda i, j, k: (i, j)),
            scratch_shapes=[pltpu.VMEM((tm, tn), jnp.float32)],
        ),
        compiler_params=pltpu.CompilerParams(
            dimension_semantics=("parallel", "parallel", "arbitrary"),
            vmem_limit_bytes=_VMEM_LIMIT,
        ),
    )(x, w, b.reshape(1, N))


def pallas_matmul_residual_ln(x, w, b, residual, gamma, beta,
                              eps=1e-5, tm=256, tk=512):
    """LayerNorm((x @ w + b) + residual) * gamma + beta, N kept un-tiled
    (LayerNorm needs the full feature dim in one block)."""
    M, K = x.shape
    _, N = w.shape
    if b is None:
        b = jnp.zeros((N,), x.dtype)
    tm = _pick_tile(M, tm, 8)
    tk = _pick_tile(K, tk, 128)
    grid = (M // tm, K // tk)
    return pl.pallas_call(
        partial(_matmul_res_ln_kernel, eps=eps),
        out_shape=jax.ShapeDtypeStruct((M, N), x.dtype),
        grid_spec=pltpu.PrefetchScalarGridSpec(
            num_scalar_prefetch=0,
            grid=grid,
            in_specs=[
                pl.BlockSpec((tm, tk), lambda i, k: (i, k)),
                pl.BlockSpec((tk, N), lambda i, k: (k, 0)),
                pl.BlockSpec((1, N), lambda i, k: (0, 0)),
                pl.BlockSpec((tm, N), lambda i, k: (i, 0)),
                pl.BlockSpec((1, N), lambda i, k: (0, 0)),
                pl.BlockSpec((1, N), lambda i, k: (0, 0)),
            ],
            out_specs=pl.BlockSpec((tm, N), lambda i, k: (i, 0)),
            scratch_shapes=[pltpu.VMEM((tm, N), jnp.float32)],
        ),
        compiler_params=pltpu.CompilerParams(
            dimension_semantics=("parallel", "arbitrary"),
            vmem_limit_bytes=_VMEM_LIMIT,
        ),
    )(x, w, b.reshape(1, N), residual, gamma.reshape(1, N), beta.reshape(1, N))


def pallas_attention(q, k):
    """q, k: (B, H, S, d_k). Returns softmax(qk^T/sqrt(d_k)) @ q  (V == Q)."""
    B, H, S, dk = q.shape
    scale = 1.0 / math.sqrt(dk)
    spec = pl.BlockSpec((1, H, S, dk), lambda b: (b, 0, 0, 0))
    # TODO(synk): for long S, tile the KV axis (flash-style online softmax with
    # m/l/acc in VMEM scratch) instead of materializing the (H, S, S) scores.
    return pl.pallas_call(
        partial(_attention_kernel, scale=scale),
        out_shape=jax.ShapeDtypeStruct((B, H, S, dk), q.dtype),
        grid_spec=pltpu.PrefetchScalarGridSpec(
            num_scalar_prefetch=0,
            grid=(B,),
            in_specs=[spec, spec],
            out_specs=spec,
        ),
        compiler_params=pltpu.CompilerParams(
            dimension_semantics=("parallel",),
            vmem_limit_bytes=_VMEM_LIMIT,
        ),
    )(q, k)


# ---------------- parameters (deterministic synthetic init) ----------------

def init_params(key, vocab_size, d_model, n_head, d_ff, N):
    del n_head
    keys = jax.random.split(key, 1 + N)
    params = {
        "emb": jax.random.normal(keys[0], (vocab_size, d_model), jnp.float32) * 0.02
    }
    s = 0.05
    layers = []
    for i in range(N):
        lk = jax.random.split(keys[1 + i], 6)
        layers.append(dict(
            W_Q=jax.random.normal(lk[0], (d_model, d_model), jnp.float32) * s,
            W_K=jax.random.normal(lk[1], (d_model, d_model), jnp.float32) * s,
            # W_V is initialized (as in __init__) but unused in forward
            # because the reference module computes V with W_Q.
            W_V=jax.random.normal(lk[2], (d_model, d_model), jnp.float32) * s,
            W_O=jax.random.normal(lk[3], (d_model, d_model), jnp.float32) * s,
            mha_gamma=jnp.ones((d_model,), jnp.float32),
            mha_beta=jnp.zeros((d_model,), jnp.float32),
            w1=jax.random.normal(lk[4], (d_model, d_ff), jnp.float32) * s,
            b1=jnp.zeros((d_ff,), jnp.float32),
            w2=jax.random.normal(lk[5], (d_ff, d_model), jnp.float32) * s,
            b2=jnp.zeros((d_model,), jnp.float32),
            ffn_gamma=jnp.ones((d_model,), jnp.float32),
            ffn_beta=jnp.zeros((d_model,), jnp.float32),
        ))
    params["layers"] = layers
    return params


def positional_encoding(seq_len, d_model):
    position = jnp.arange(seq_len, dtype=jnp.float32)[:, None]
    div_term = jnp.exp(
        jnp.arange(0, d_model, 2, dtype=jnp.float32) * -(math.log(10000.0) / d_model)
    )
    pe = jnp.zeros((seq_len, d_model), jnp.float32)
    pe = pe.at[:, 0::2].set(jnp.sin(position * div_term))
    pe = pe.at[:, 1::2].set(jnp.cos(position * div_term))
    return pe


# ---------------- forward pass ----------------

@partial(jax.jit, static_argnames=("n_head",))
def encoder_forward(params, tokens, *, n_head):
    B, S = tokens.shape
    D = params["emb"].shape[1]
    d_k = D // n_head

    # Embedding gather + positional encoding stay as XLA glue (constant-folded
    # / fused under jit); dropout is identity in eval mode.
    x = jnp.take(params["emb"], tokens, axis=0) * math.sqrt(D)      # (B, S, D)
    x = x + positional_encoding(S, D)[None]

    h = x.reshape(B * S, D)   # flatten once; stay flat across layers

    def to_heads(t):          # (B*S, D) -> (B, H, S, d_k)   (XLA glue under jit)
        return t.reshape(B, S, n_head, d_k).transpose(0, 2, 1, 3)

    for layer in params["layers"]:
        residual = h

        # --- MultiHeadedAttention ---
        # Fused Q|K projection: one read of h, one matmul of width 2D.
        w_qk = jnp.concatenate([layer["W_Q"], layer["W_K"]], axis=1)
        qk = pallas_matmul_bias(h, w_qk)                             # (B*S, 2D)
        q, k = qk[:, :D], qk[:, D:]

        # V == Q (reference bug `V = self.W_Q(V)`), so only q/k are passed.
        ctx = pallas_attention(to_heads(q), to_heads(k))             # (B,H,S,dk)
        concat = ctx.transpose(0, 2, 1, 3).reshape(B * S, D)

        # W_O projection with fused residual-add + LayerNorm epilogue.
        h = pallas_matmul_residual_ln(
            concat, layer["W_O"], None, residual,
            layer["mha_gamma"], layer["mha_beta"])

        # --- FeedforwardNet ---
        ff = pallas_matmul_bias(h, layer["w1"], layer["b1"], relu=True)
        h = pallas_matmul_residual_ln(
            ff, layer["w2"], layer["b2"], h,
            layer["ffn_gamma"], layer["ffn_beta"])

    return h.reshape(B, S, D)


if __name__ == "__main__":
    # small shapes consistent with the module
    vocab_size, d_model, n_head, d_ff, N = 50, 32, 4, 64, 2
    B, S = 2, 8

    key = jax.random.PRNGKey(0)
    pkey, tkey = jax.random.split(key)
    params = init_params(pkey, vocab_size, d_model, n_head, d_ff, N)
    tokens = jax.random.randint(tkey, (B, S), 0, vocab_size, dtype=jnp.int32)

    out = encoder_forward(params, tokens, n_head=n_head)
    out = jax.block_until_ready(out)
    assert out.shape == (B, S, d_model)
    assert bool(jnp.all(jnp.isfinite(out)))
    print("KERNEL_OK")
</pallas_src>

<mosaic_0001>
module attributes {stable_mosaic.version = 11 : i64} {
  func.func @_matmul_bias_kernel(%arg0: i32, %arg1: i32, %arg2: i32, %arg3: memref<16x32xf32, #tpu.memory_space<vmem>>, %arg4: memref<32x64xf32, #tpu.memory_space<vmem>>, %arg5: memref<1x64xf32, #tpu.memory_space<vmem>>, %arg6: memref<16x64xf32, #tpu.memory_space<vmem>>, %arg7: memref<16x64xf32, #tpu.memory_space<vmem>>) attributes {dimension_semantics = [#tpu.dimension_semantics<parallel>, #tpu.dimension_semantics<parallel>, #tpu.dimension_semantics<arbitrary>], iteration_bounds = array<i64: 1, 1, 1>, scalar_prefetch = 0 : i64, scratch_operands = 1 : i64, tpu.core_type = #tpu.core_type<tc>, window_params = [{transform_indices = @transform_0, window_bounds = array<i64: 16, 32>}, {transform_indices = @transform_1, window_bounds = array<i64: 32, 64>}, {transform_indices = @transform_2, window_bounds = array<i64: 1, 64>}, {transform_indices = @transform_3, window_bounds = array<i64: 16, 64>}]} {
    %c0_i32 = arith.constant 0 : i32
    %0 = arith.cmpi eq, %arg2, %c0_i32 : i32
    %1 = arith.extui %0 : i1 to i32
    %c0_i32_0 = arith.constant 0 : i32
    %2 = arith.cmpi ne, %1, %c0_i32_0 : i32
    scf.if %2 {
      %cst_10 = arith.constant 0.000000e+00 : f32
      %14 = vector.broadcast %cst_10 : f32 to vector<16x64xf32>
      %c0_11 = arith.constant 0 : index
      %c0_12 = arith.constant 0 : index
      %15 = vector.load %arg7[%c0_11, %c0_12] : memref<16x64xf32, #tpu.memory_space<vmem>>, vector<16x64xf32>
      tpu.vector_store %arg7[%c0_11, %c0_12], %14 {strides = array<i32>} : memref<16x64xf32, #tpu.memory_space<vmem>>, vector<16x64xf32>,
    } else {
    }
    %c0 = arith.constant 0 : index
    %c0_1 = arith.constant 0 : index
    %3 = vector.load %arg7[%c0, %c0_1] : memref<16x64xf32, #tpu.memory_space<vmem>>, vector<16x64xf32>
    %c0_2 = arith.constant 0 : index
    %c0_3 = arith.constant 0 : index
    %4 = vector.load %arg3[%c0_2, %c0_3] : memref<16x32xf32, #tpu.memory_space<vmem>>, vector<16x32xf32>
    %5 = arith.truncf %4 : vector<16x32xf32> to vector<16x32xbf16>
    %c0_4 = arith.constant 0 : index
    %c0_5 = arith.constant 0 : index
    %6 = vector.load %arg4[%c0_4, %c0_5] : memref<32x64xf32, #tpu.memory_space<vmem>>, vector<32x64xf32>
    %7 = arith.truncf %6 : vector<32x64xf32> to vector<32x64xbf16>
    %cst = arith.constant dense<0.000000e+00> : vector<16x64xf32>
    %8 = tpu.matmul %5, %7, %cst {dimension_numbers = #tpu.dot_dimension_numbers<[1], [0], [0], [1], [0, 0, 1, 1], [], []>} : vector<16x32xbf16>, vector<32x64xbf16>, vector<16x64xf32> -> vector<16x64xf32>
    %9 = arith.addf %3, %8 : vector<16x64xf32>
    %c0_6 = arith.constant 0 : index
    %c0_7 = arith.constant 0 : index
    %10 = vector.load %arg7[%c0_6, %c0_7] : memref<16x64xf32, #tpu.memory_space<vmem>>, vector<16x64xf32>
    tpu.vector_store %arg7[%c0_6, %c0_7], %9 {strides = array<i32>} : memref<16x64xf32, #tpu.memory_space<vmem>>, vector<16x64xf32>,
    %c0_i32_8 = arith.constant 0 : i32
    %11 = arith.cmpi eq, %arg2, %c0_i32_8 : i32
    %12 = arith.extui %11 : i1 to i32
    %c0_i32_9 = arith.constant 0 : i32
    %13 = arith.cmpi ne, %12, %c0_i32_9 : i32
    scf.if %13 {
      %c0_10 = arith.constant 0 : index
      %c0_11 = arith.constant 0 : index
      %14 = vector.load %arg7[%c0_10, %c0_11] : memref<16x64xf32, #tpu.memory_space<vmem>>, vector<16x64xf32>
      %c0_12 = arith.constant 0 : index
      %c0_13 = arith.constant 0 : index
      %15 = vector.load %arg5[%c0_12, %c0_13] : memref<1x64xf32, #tpu.memory_space<vmem>>, vector<1x64xf32>
      %16 = vector.broadcast %15 : vector<1x64xf32> to vector<16x64xf32>
      %17 = arith.addf %14, %16 : vector<16x64xf32>
      %c0_14 = arith.constant 0 : index
      %c0_15 = arith.constant 0 : index
      %18 = vector.load %arg6[%c0_14, %c0_15] : memref<16x64xf32, #tpu.memory_space<vmem>>, vector<16x64xf32>
      tpu.vector_store %arg6[%c0_14, %c0_15], %17 {strides = array<i32>} : memref<16x64xf32, #tpu.memory_space<vmem>>, vector<16x64xf32>,
    } else {
    }
    return
  }
  func.func @transform_0(%arg0: i32, %arg1: i32, %arg2: i32) -> (i32, i32) {
    %c0_i32 = arith.constant 0 : i32
    return %arg0, %arg2 : i32, i32
  }
  func.func @transform_1(%arg0: i32, %arg1: i32, %arg2: i32) -> (i32, i32) {
    %c0_i32 = arith.constant 0 : i32
    return %arg2, %arg1 : i32, i32
  }
  func.func @transform_2(%arg0: i32, %arg1: i32, %arg2: i32) -> (i32, i32) {
    %c0_i32 = arith.constant 0 : i32
    %c0_i32_0 = arith.constant 0 : i32
    return %c0_i32, %arg1 : i32, i32
  }
  func.func @transform_3(%arg0: i32, %arg1: i32, %arg2: i32) -> (i32, i32) {
    %c0_i32 = arith.constant 0 : i32
    return %arg0, %arg1 : i32, i32
  }
}

module attributes {stable_mosaic.version = 11 : i64} {
  func.func @_attention_kernel(%arg0: i32, %arg1: memref<1x4x8x8xf32, #tpu.memory_space<vmem>>, %arg2: memref<1x4x8x8xf32, #tpu.memory_space<vmem>>, %arg3: memref<1x4x8x8xf32, #tpu.memory_space<vmem>>) attributes {dimension_semantics = [#tpu.dimension_semantics<parallel>], iteration_bounds = array<i64: 2>, scalar_prefetch = 0 : i64, scratch_operands = 0 : i64, tpu.core_type = #tpu.core_type<tc>, window_params = [{transform_indices = @transform_0, window_bounds = array<i64: 1, 4, 8, 8>}, {transform_indices = @transform_1, window_bounds = array<i64: 1, 4, 8, 8>}, {transform_indices = @transform_2, window_bounds = array<i64: 1, 4, 8, 8>}]} {
    %c0 = arith.constant 0 : index
    %c0_0 = arith.constant 0 : index
    %c0_1 = arith.constant 0 : index
    %c0_2 = arith.constant 0 : index
    %0 = vector.load %arg1[%c0, %c0_0, %c0_1, %c0_2] : memref<1x4x8x8xf32, #tpu.memory_space<vmem>>, vector<1x4x8x8xf32>
    %1 = vector.shape_cast %0 : vector<1x4x8x8xf32> to vector<4x8x8xf32>
    %c0_3 = arith.constant 0 : index
    %c0_4 = arith.constant 0 : index
    %c0_5 = arith.constant 0 : index
    %c0_6 = arith.constant 0 : index
    %2 = vector.load %arg2[%c0_3, %c0_4, %c0_5, %c0_6] : memref<1x4x8x8xf32, #tpu.memory_space<vmem>>, vector<1x4x8x8xf32>
    %3 = vector.shape_cast %2 : vector<1x4x8x8xf32> to vector<4x8x8xf32>
    %4 = arith.truncf %1 : vector<4x8x8xf32> to vector<4x8x8xbf16>
    %5 = arith.truncf %3 : vector<4x8x8xf32> to vector<4x8x8xbf16>
    "tpu.trace_start"() <{level = 10 : i32, message = "hqd,hkd->hqk"}> : () -> ()
    %cst = arith.constant dense<0.000000e+00> : vector<4x8x8xf32>
    %6 = tpu.matmul %4, %5, %cst {dimension_numbers = #tpu.dot_dimension_numbers<[2], [2], [1], [1], [0, 0, 0, 1, 1, 1], [0], [0]>} : vector<4x8x8xbf16>, vector<4x8x8xbf16>, vector<4x8x8xf32> -> vector<4x8x8xf32>
    "tpu.trace_stop"() : () -> ()
    %cst_7 = arith.constant 0.353553385 : f32
    %7 = vector.broadcast %cst_7 : f32 to vector<4x8x8xf32>
    %8 = arith.mulf %6, %7 : vector<4x8x8xf32>
    %cst_8 = arith.constant dense<0xFF800000> : vector<4x8xf32>
    %9 = vector.multi_reduction <maximumf>, %8, %cst_8 [2] : vector<4x8x8xf32> to vector<4x8xf32>
    %10 = vector.shape_cast %9 : vector<4x8xf32> to vector<4x8x1xf32>
    %11 = vector.broadcast %10 : vector<4x8x1xf32> to vector<4x8x8xf32>
    %12 = arith.subf %8, %11 : vector<4x8x8xf32>
    %13 = math.exp %12 : vector<4x8x8xf32>
    %cst_9 = arith.constant dense<0.000000e+00> : vector<4x8xf32>
    %14 = vector.multi_reduction <add>, %13, %cst_9 [2] : vector<4x8x8xf32> to vector<4x8xf32>
    %15 = vector.shape_cast %14 : vector<4x8xf32> to vector<4x8x1xf32>
    %16 = tpu.reciprocal %15 {approx = true} : vector<4x8x1xf32> -> vector<4x8x1xf32>
    %17 = vector.broadcast %16 : vector<4x8x1xf32> to vector<4x8x8xf32>
    %18 = arith.mulf %13, %17 : vector<4x8x8xf32>
    %19 = arith.truncf %18 : vector<4x8x8xf32> to vector<4x8x8xbf16>
    "tpu.trace_start"() <{level = 10 : i32, message = "hqk,hkd->hqd"}> : () -> ()
    %cst_10 = arith.constant dense<0.000000e+00> : vector<4x8x8xf32>
    %20 = tpu.matmul %19, %4, %cst_10 {dimension_numbers = #tpu.dot_dimension_numbers<[2], [1], [1], [2], [0, 0, 0, 1, 1, 2], [0], [0]>} : vector<4x8x8xbf16>, vector<4x8x8xbf16>, vector<4x8x8xf32> -> vector<4x8x8xf32>
    "tpu.trace_stop"() : () -> ()
    %c0_11 = arith.constant 0 : index
    %c0_12 = arith.constant 0 : index
    %c0_13 = arith.constant 0 : index
    %c0_14 = arith.constant 0 : index
    %21 = vector.load %arg3[%c0_11, %c0_12, %c0_13, %c0_14] : memref<1x4x8x8xf32, #tpu.memory_space<vmem>>, vector<1x4x8x8xf32>
    %22 = vector.shape_cast %21 : vector<1x4x8x8xf32> to vector<4x8x8xf32>
    %23 = vector.shape_cast %20 : vector<4x8x8xf32> to vector<1x4x8x8xf32>
    tpu.vector_store %arg3[%c0_11, %c0_12, %c0_13, %c0_14], %23 {strides = array<i32>} : memref<1x4x8x8xf32, #tpu.memory_space<vmem>>, vector<1x4x8x8xf32>,
    return
  }
  func.func @transform_0(%arg0: i32) -> (i32, i32, i32, i32) {
    %c0_i32 = arith.constant 0 : i32
    %c0_i32_0 = arith.constant 0 : i32
    %c0_i32_1 = arith.constant 0 : i32
    %c0_i32_2 = arith.constant 0 : i32
    return %arg0, %c0_i32, %c0_i32_0, %c0_i32_1 : i32, i32, i32, i32
  }
  func.func @transform_1(%arg0: i32) -> (i32, i32, i32, i32) {
    %c0_i32 = arith.constant 0 : i32
    %c0_i32_0 = arith.constant 0 : i32
    %c0_i32_1 = arith.constant 0 : i32
    %c0_i32_2 = arith.constant 0 : i32
    return %arg0, %c0_i32, %c0_i32_0, %c0_i32_1 : i32, i32, i32, i32
  }
  func.func @transform_2(%arg0: i32) -> (i32, i32, i32, i32) {
    %c0_i32 = arith.constant 0 : i32
    %c0_i32_0 = arith.constant 0 : i32
    %c0_i32_1 = arith.constant 0 : i32
    %c0_i32_2 = arith.constant 0 : i32
    return %arg0, %c0_i32, %c0_i32_0, %c0_i32_1 : i32, i32, i32, i32
  }
}

module attributes {stable_mosaic.version = 11 : i64} {
  func.func @_matmul_res_ln_kernel(%arg0: i32, %arg1: i32, %arg2: memref<16x32xf32, #tpu.memory_space<vmem>>, %arg3: memref<32x32xf32, #tpu.memory_space<vmem>>, %arg4: memref<1x32xf32, #tpu.memory_space<vmem>>, %arg5: memref<16x32xf32, #tpu.memory_space<vmem>>, %arg6: memref<1x32xf32, #tpu.memory_space<vmem>>, %arg7: memref<1x32xf32, #tpu.memory_space<vmem>>, %arg8: memref<16x32xf32, #tpu.memory_space<vmem>>, %arg9: memref<16x32xf32, #tpu.memory_space<vmem>>) attributes {dimension_semantics = [#tpu.dimension_semantics<parallel>, #tpu.dimension_semantics<arbitrary>], iteration_bounds = array<i64: 1, 1>, scalar_prefetch = 0 : i64, scratch_operands = 1 : i64, tpu.core_type = #tpu.core_type<tc>, window_params = [{transform_indices = @transform_0, window_bounds = array<i64: 16, 32>}, {transform_indices = @transform_1, window_bounds = array<i64: 32, 32>}, {pipeline_mode = #tpu.pipeline_mode<synchronous>, transform_indices = @transform_2, window_bounds = array<i64: 1, 32>}, {transform_indices = @transform_3, window_bounds = array<i64: 16, 32>}, {pipeline_mode = #tpu.pipeline_mode<synchronous>, transform_indices = @transform_4, window_bounds = array<i64: 1, 32>}, {pipeline_mode = #tpu.pipeline_mode<synchronous>, transform_indices = @transform_5, window_bounds = array<i64: 1, 32>}, {transform_indices = @transform_6, window_bounds = array<i64: 16, 32>}]} {
    %c0_i32 = arith.constant 0 : i32
    %0 = arith.cmpi eq, %arg1, %c0_i32 : i32
    %1 = arith.extui %0 : i1 to i32
    %c0_i32_0 = arith.constant 0 : i32
    %2 = arith.cmpi ne, %1, %c0_i32_0 : i32
    scf.if %2 {
      %cst_10 = arith.constant 0.000000e+00 : f32
      %14 = vector.broadcast %cst_10 : f32 to vector<16x32xf32>
      %c0_11 = arith.constant 0 : index
      %c0_12 = arith.constant 0 : index
      %15 = vector.load %arg9[%c0_11, %c0_12] : memref<16x32xf32, #tpu.memory_space<vmem>>, vector<16x32xf32>
      tpu.vector_store %arg9[%c0_11, %c0_12], %14 {strides = array<i32>} : memref<16x32xf32, #tpu.memory_space<vmem>>, vector<16x32xf32>,
    } else {
    }
    %c0 = arith.constant 0 : index
    %c0_1 = arith.constant 0 : index
    %3 = vector.load %arg9[%c0, %c0_1] : memref<16x32xf32, #tpu.memory_space<vmem>>, vector<16x32xf32>
    %c0_2 = arith.constant 0 : index
    %c0_3 = arith.constant 0 : index
    %4 = vector.load %arg2[%c0_2, %c0_3] : memref<16x32xf32, #tpu.memory_space<vmem>>, vector<16x32xf32>
    %5 = arith.truncf %4 : vector<16x32xf32> to vector<16x32xbf16>
    %c0_4 = arith.constant 0 : index
    %c0_5 = arith.constant 0 : index
    %6 = vector.load %arg3[%c0_4, %c0_5] : memref<32x32xf32, #tpu.memory_space<vmem>>, vector<32x32xf32>
    %7 = arith.truncf %6 : vector<32x32xf32> to vector<32x32xbf16>
    %cst = arith.constant dense<0.000000e+00> : vector<16x32xf32>
    %8 = tpu.matmul %5, %7, %cst {dimension_numbers = #tpu.dot_dimension_numbers<[1], [0], [0], [1], [0, 0, 1, 1], [], []>} : vector<16x32xbf16>, vector<32x32xbf16>, vector<16x32xf32> -> vector<16x32xf32>
    %9 = arith.addf %3, %8 : vector<16x32xf32>
    %c0_6 = arith.constant 0 : index
    %c0_7 = arith.constant 0 : index
    %10 = vector.load %arg9[%c0_6, %c0_7] : memref<16x32xf32, #tpu.memory_space<vmem>>, vector<16x32xf32>
    tpu.vector_store %arg9[%c0_6, %c0_7], %9 {strides = array<i32>} : memref<16x32xf32, #tpu.memory_space<vmem>>, vector<16x32xf32>,
    %c0_i32_8 = arith.constant 0 : i32
    %11 = arith.cmpi eq, %arg1, %c0_i32_8 : i32
    %12 = arith.extui %11 : i1 to i32
    %c0_i32_9 = arith.constant 0 : i32
    %13 = arith.cmpi ne, %12, %c0_i32_9 : i32
    scf.if %13 {
      %c0_10 = arith.constant 0 : index
      %c0_11 = arith.constant 0 : index
      %14 = vector.load %arg9[%c0_10, %c0_11] : memref<16x32xf32, #tpu.memory_space<vmem>>, vector<16x32xf32>
      %c0_12 = arith.constant 0 : index
      %c0_13 = arith.constant 0 : index
      %15 = vector.load %arg4[%c0_12, %c0_13] : memref<1x32xf32, #tpu.memory_space<vmem>>, vector<1x32xf32>
      %16 = vector.broadcast %15 : vector<1x32xf32> to vector<16x32xf32>
      %17 = arith.addf %14, %16 : vector<16x32xf32>
      %c0_14 = arith.constant 0 : index
      %c0_15 = arith.constant 0 : index
      %18 = vector.load %arg5[%c0_14, %c0_15] : memref<16x32xf32, #tpu.memory_space<vmem>>, vector<16x32xf32>
      %19 = arith.addf %17, %18 : vector<16x32xf32>
      %cst_16 = arith.constant dense<0.000000e+00> : vector<16xf32>
      %20 = vector.multi_reduction <add>, %19, %cst_16 [1] : vector<16x32xf32> to vector<16xf32>
      %21 = vector.shape_cast %20 : vector<16xf32> to vector<16x1xf32>
      %cst_17 = arith.constant 3.200000e+01 : f32
      %22 = vector.broadcast %cst_17 : f32 to vector<16x1xf32>
      %23 = arith.divf %21, %22 : vector<16x1xf32>
      %24 = vector.broadcast %23 : vector<16x1xf32> to vector<16x32xf32>
      %25 = arith.subf %19, %24 : vector<16x32xf32>
      %26 = arith.mulf %25, %25 : vector<16x32xf32>
      %cst_18 = arith.constant dense<0.000000e+00> : vector<16xf32>
      %27 = vector.multi_reduction <add>, %26, %cst_18 [1] : vector<16x32xf32> to vector<16xf32>
      %28 = vector.shape_cast %27 : vector<16xf32> to vector<16x1xf32>
      %cst_19 = arith.constant 3.200000e+01 : f32
      %29 = vector.broadcast %cst_19 : f32 to vector<16x1xf32>
      %30 = arith.divf %28, %29 : vector<16x1xf32>
      %31 = vector.broadcast %23 : vector<16x1xf32> to vector<16x32xf32>
      %32 = arith.subf %19, %31 : vector<16x32xf32>
      %cst_20 = arith.constant 9.99999974E-6 : f32
      %33 = vector.broadcast %cst_20 : f32 to vector<16x1xf32>
      %34 = arith.addf %30, %33 : vector<16x1xf32>
      %35 = math.rsqrt %34 : vector<16x1xf32>
      %36 = vector.broadcast %35 : vector<16x1xf32> to vector<16x32xf32>
      %37 = arith.mulf %32, %36 : vector<16x32xf32>
      %c0_21 = arith.constant 0 : index
      %c0_22 = arith.constant 0 : index
      %38 = vector.load %arg6[%c0_21, %c0_22] : memref<1x32xf32, #tpu.memory_space<vmem>>, vector<1x32xf32>
      %39 = vector.broadcast %38 : vector<1x32xf32> to vector<16x32xf32>
      %40 = arith.mulf %37, %39 : vector<16x32xf32>
      %c0_23 = arith.constant 0 : index
      %c0_24 = arith.constant 0 : index
      %41 = vector.load %arg7[%c0_23, %c0_24] : memref<1x32xf32, #tpu.memory_space<vmem>>, vector<1x32xf32>
      %42 = vector.broadcast %41 : vector<1x32xf32> to vector<16x32xf32>
      %43 = arith.addf %40, %42 : vector<16x32xf32>
      %c0_25 = arith.constant 0 : index
      %c0_26 = arith.constant 0 : index
      %44 = vector.load %arg8[%c0_25, %c0_26] : memref<16x32xf32, #tpu.memory_space<vmem>>, vector<16x32xf32>
      tpu.vector_store %arg8[%c0_25, %c0_26], %43 {strides = array<i32>} : memref<16x32xf32, #tpu.memory_space<vmem>>, vector<16x32xf32>,
    } else {
    }
    return
  }
  func.func @transform_0(%arg0: i32, %arg1: i32) -> (i32, i32) {
    %c0_i32 = arith.constant 0 : i32
    return %arg0, %arg1 : i32, i32
  }
  func.func @transform_1(%arg0: i32, %arg1: i32) -> (i32, i32) {
    %c0_i32 = arith.constant 0 : i32
    %c0_i32_0 = arith.constant 0 : i32
    return %arg1, %c0_i32 : i32, i32
  }
  func.func @transform_2(%arg0: i32, %arg1: i32) -> (i32, i32) {
    %c0_i32 = arith.constant 0 : i32
    %c0_i32_0 = arith.constant 0 : i32
    %c0_i32_1 = arith.constant 0 : i32
    return %c0_i32, %c0_i32_0 : i32, i32
  }
  func.func @transform_3(%arg0: i32, %arg1: i32) -> (i32, i32) {
    %c0_i32 = arith.constant 0 : i32
    %c0_i32_0 = arith.constant 0 : i32
    return %arg0, %c0_i32 : i32, i32
  }
  func.func @transform_4(%arg0: i32, %arg1: i32) -> (i32, i32) {
    %c0_i32 = arith.constant 0 : i32
    %c0_i32_0 = arith.constant 0 : i32
    %c0_i32_1 = arith.constant 0 : i32
    return %c0_i32, %c0_i32_0 : i32, i32
  }
  func.func @transform_5(%arg0: i32, %arg1: i32) -> (i32, i32) {
    %c0_i32 = arith.constant 0 : i32
    %c0_i32_0 = arith.constant 0 : i32
    %c0_i32_1 = arith.constant 0 : i32
    return %c0_i32, %c0_i32_0 : i32, i32
  }
  func.func @transform_6(%arg0: i32, %arg1: i32) -> (i32, i32) {
    %c0_i32 = arith.constant 0 : i32
    %c0_i32_0 = arith.constant 0 : i32
    return %arg0, %c0_i32 : i32, i32
  }
}

module attributes {stable_mosaic.version = 11 : i64} {
  func.func @_matmul_bias_kernel(%arg0: i32, %arg1: i32, %arg2: i32, %arg3: memref<16x32xf32, #tpu.memory_space<vmem>>, %arg4: memref<32x64xf32, #tpu.memory_space<vmem>>, %arg5: memref<1x64xf32, #tpu.memory_space<vmem>>, %arg6: memref<16x64xf32, #tpu.memory_space<vmem>>, %arg7: memref<16x64xf32, #tpu.memory_space<vmem>>) attributes {dimension_semantics = [#tpu.dimension_semantics<parallel>, #tpu.dimension_semantics<parallel>, #tpu.dimension_semantics<arbitrary>], iteration_bounds = array<i64: 1, 1, 1>, scalar_prefetch = 0 : i64, scratch_operands = 1 : i64, tpu.core_type = #tpu.core_type<tc>, window_params = [{transform_indices = @transform_0, window_bounds = array<i64: 16, 32>}, {transform_indices = @transform_1, window_bounds = array<i64: 32, 64>}, {transform_indices = @transform_2, window_bounds = array<i64: 1, 64>}, {transform_indices = @transform_3, window_bounds = array<i64: 16, 64>}]} {
    %c0_i32 = arith.constant 0 : i32
    %0 = arith.cmpi eq, %arg2, %c0_i32 : i32
    %1 = arith.extui %0 : i1 to i32
    %c0_i32_0 = arith.constant 0 : i32
    %2 = arith.cmpi ne, %1, %c0_i32_0 : i32
    scf.if %2 {
      %cst_10 = arith.constant 0.000000e+00 : f32
      %14 = vector.broadcast %cst_10 : f32 to vector<16x64xf32>
      %c0_11 = arith.constant 0 : index
      %c0_12 = arith.constant 0 : index
      %15 = vector.load %arg7[%c0_11, %c0_12] : memref<16x64xf32, #tpu.memory_space<vmem>>, vector<16x64xf32>
      tpu.vector_store %arg7[%c0_11, %c0_12], %14 {strides = array<i32>} : memref<16x64xf32, #tpu.memory_space<vmem>>, vector<16x64xf32>,
    } else {
    }
    %c0 = arith.constant 0 : index
    %c0_1 = arith.constant 0 : index
    %3 = vector.load %arg7[%c0, %c0_1] : memref<16x64xf32, #tpu.memory_space<vmem>>, vector<16x64xf32>
    %c0_2 = arith.constant 0 : index
    %c0_3 = arith.constant 0 : index
    %4 = vector.load %arg3[%c0_2, %c0_3] : memref<16x32xf32, #tpu.memory_space<vmem>>, vector<16x32xf32>
    %5 = arith.truncf %4 : vector<16x32xf32> to vector<16x32xbf16>
    %c0_4 = arith.constant 0 : index
    %c0_5 = arith.constant 0 : index
    %6 = vector.load %arg4[%c0_4, %c0_5] : memref<32x64xf32, #tpu.memory_space<vmem>>, vector<32x64xf32>
    %7 = arith.truncf %6 : vector<32x64xf32> to vector<32x64xbf16>
    %cst = arith.constant dense<0.000000e+00> : vector<16x64xf32>
    %8 = tpu.matmul %5, %7, %cst {dimension_numbers = #tpu.dot_dimension_numbers<[1], [0], [0], [1], [0, 0, 1, 1], [], []>} : vector<16x32xbf16>, vector<32x64xbf16>, vector<16x64xf32> -> vector<16x64xf32>
    %9 = arith.addf %3, %8 : vector<16x64xf32>
    %c0_6 = arith.constant 0 : index
    %c0_7 = arith.constant 0 : index
    %10 = vector.load %arg7[%c0_6, %c0_7] : memref<16x64xf32, #tpu.memory_space<vmem>>, vector<16x64xf32>
    tpu.vector_store %arg7[%c0_6, %c0_7], %9 {strides = array<i32>} : memref<16x64xf32, #tpu.memory_space<vmem>>, vector<16x64xf32>,
    %c0_i32_8 = arith.constant 0 : i32
    %11 = arith.cmpi eq, %arg2, %c0_i32_8 : i32
    %12 = arith.extui %11 : i1 to i32
    %c0_i32_9 = arith.constant 0 : i32
    %13 = arith.cmpi ne, %12, %c0_i32_9 : i32
    scf.if %13 {
      %c0_10 = arith.constant 0 : index
      %c0_11 = arith.constant 0 : index
      %14 = vector.load %arg7[%c0_10, %c0_11] : memref<16x64xf32, #tpu.memory_space<vmem>>, vector<16x64xf32>
      %c0_12 = arith.constant 0 : index
      %c0_13 = arith.constant 0 : index
      %15 = vector.load %arg5[%c0_12, %c0_13] : memref<1x64xf32, #tpu.memory_space<vmem>>, vector<1x64xf32>
      %16 = vector.broadcast %15 : vector<1x64xf32> to vector<16x64xf32>
      %17 = arith.addf %14, %16 : vector<16x64xf32>
      %cst_14 = arith.constant 0.000000e+00 : f32
      %18 = vector.broadcast %cst_14 : f32 to vector<16x64xf32>
      %19 = arith.maximumf %17, %18 : vector<16x64xf32>
      %c0_15 = arith.constant 0 : index
      %c0_16 = arith.constant 0 : index
      %20 = vector.load %arg6[%c0_15, %c0_16] : memref<16x64xf32, #tpu.memory_space<vmem>>, vector<16x64xf32>
      tpu.vector_store %arg6[%c0_15, %c0_16], %19 {strides = array<i32>} : memref<16x64xf32, #tpu.memory_space<vmem>>, vector<16x64xf32>,
    } else {
    }
    return
  }
  func.func @transform_0(%arg0: i32, %arg1: i32, %arg2: i32) -> (i32, i32) {
    %c0_i32 = arith.constant 0 : i32
    return %arg0, %arg2 : i32, i32
  }
  func.func @transform_1(%arg0: i32, %arg1: i32, %arg2: i32) -> (i32, i32) {
    %c0_i32 = arith.constant 0 : i32
    return %arg2, %arg1 : i32, i32
  }
  func.func @transform_2(%arg0: i32, %arg1: i32, %arg2: i32) -> (i32, i32) {
    %c0_i32 = arith.constant 0 : i32
    %c0_i32_0 = arith.constant 0 : i32
    return %c0_i32, %arg1 : i32, i32
  }
  func.func @transform_3(%arg0: i32, %arg1: i32, %arg2: i32) -> (i32, i32) {
    %c0_i32 = arith.constant 0 : i32
    return %arg0, %arg1 : i32, i32
  }
}

module attributes {stable_mosaic.version = 11 : i64} {
  func.func @_matmul_res_ln_kernel(%arg0: i32, %arg1: i32, %arg2: memref<16x64xf32, #tpu.memory_space<vmem>>, %arg3: memref<64x32xf32, #tpu.memory_space<vmem>>, %arg4: memref<1x32xf32, #tpu.memory_space<vmem>>, %arg5: memref<16x32xf32, #tpu.memory_space<vmem>>, %arg6: memref<1x32xf32, #tpu.memory_space<vmem>>, %arg7: memref<1x32xf32, #tpu.memory_space<vmem>>, %arg8: memref<16x32xf32, #tpu.memory_space<vmem>>, %arg9: memref<16x32xf32, #tpu.memory_space<vmem>>) attributes {dimension_semantics = [#tpu.dimension_semantics<parallel>, #tpu.dimension_semantics<arbitrary>], iteration_bounds = array<i64: 1, 1>, scalar_prefetch = 0 : i64, scratch_operands = 1 : i64, tpu.core_type = #tpu.core_type<tc>, window_params = [{transform_indices = @transform_0, window_bounds = array<i64: 16, 64>}, {transform_indices = @transform_1, window_bounds = array<i64: 64, 32>}, {pipeline_mode = #tpu.pipeline_mode<synchronous>, transform_indices = @transform_2, window_bounds = array<i64: 1, 32>}, {transform_indices = @transform_3, window_bounds = array<i64: 16, 32>}, {pipeline_mode = #tpu.pipeline_mode<synchronous>, transform_indices = @transform_4, window_bounds = array<i64: 1, 32>}, {pipeline_mode = #tpu.pipeline_mode<synchronous>, transform_indices = @transform_5, window_bounds = array<i64: 1, 32>}, {transform_indices = @transform_6, window_bounds = array<i64: 16, 32>}]} {
    %c0_i32 = arith.constant 0 : i32
    %0 = arith.cmpi eq, %arg1, %c0_i32 : i32
    %1 = arith.extui %0 : i1 to i32
    %c0_i32_0 = arith.constant 0 : i32
    %2 = arith.cmpi ne, %1, %c0_i32_0 : i32
    scf.if %2 {
      %cst_10 = arith.constant 0.000000e+00 : f32
      %14 = vector.broadcast %cst_10 : f32 to vector<16x32xf32>
      %c0_11 = arith.constant 0 : index
      %c0_12 = arith.constant 0 : index
      %15 = vector.load %arg9[%c0_11, %c0_12] : memref<16x32xf32, #tpu.memory_space<vmem>>, vector<16x32xf32>
      tpu.vector_store %arg9[%c0_11, %c0_12], %14 {strides = array<i32>} : memref<16x32xf32, #tpu.memory_space<vmem>>, vector<16x32xf32>,
    } else {
    }
    %c0 = arith.constant 0 : index
    %c0_1 = arith.constant 0 : index
    %3 = vector.load %arg9[%c0, %c0_1] : memref<16x32xf32, #tpu.memory_space<vmem>>, vector<16x32xf32>
    %c0_2 = arith.constant 0 : index
    %c0_3 = arith.constant 0 : index
    %4 = vector.load %arg2[%c0_2, %c0_3] : memref<16x64xf32, #tpu.memory_space<vmem>>, vector<16x64xf32>
    %5 = arith.truncf %4 : vector<16x64xf32> to vector<16x64xbf16>
    %c0_4 = arith.constant 0 : index
    %c0_5 = arith.constant 0 : index
    %6 = vector.load %arg3[%c0_4, %c0_5] : memref<64x32xf32, #tpu.memory_space<vmem>>, vector<64x32xf32>
    %7 = arith.truncf %6 : vector<64x32xf32> to vector<64x32xbf16>
    %cst = arith.constant dense<0.000000e+00> : vector<16x32xf32>
    %8 = tpu.matmul %5, %7, %cst {dimension_numbers = #tpu.dot_dimension_numbers<[1], [0], [0], [1], [0, 0, 1, 1], [], []>} : vector<16x64xbf16>, vector<64x32xbf16>, vector<16x32xf32> -> vector<16x32xf32>
    %9 = arith.addf %3, %8 : vector<16x32xf32>
    %c0_6 = arith.constant 0 : index
    %c0_7 = arith.constant 0 : index
    %10 = vector.load %arg9[%c0_6, %c0_7] : memref<16x32xf32, #tpu.memory_space<vmem>>, vector<16x32xf32>
    tpu.vector_store %arg9[%c0_6, %c0_7], %9 {strides = array<i32>} : memref<16x32xf32, #tpu.memory_space<vmem>>, vector<16x32xf32>,
    %c0_i32_8 = arith.constant 0 : i32
    %11 = arith.cmpi eq, %arg1, %c0_i32_8 : i32
    %12 = arith.extui %11 : i1 to i32
    %c0_i32_9 = arith.constant 0 : i32
    %13 = arith.cmpi ne, %12, %c0_i32_9 : i32
    scf.if %13 {
      %c0_10 = arith.constant 0 : index
      %c0_11 = arith.constant 0 : index
      %14 = vector.load %arg9[%c0_10, %c0_11] : memref<16x32xf32, #tpu.memory_space<vmem>>, vector<16x32xf32>
      %c0_12 = arith.constant 0 : index
      %c0_13 = arith.constant 0 : index
      %15 = vector.load %arg4[%c0_12, %c0_13] : memref<1x32xf32, #tpu.memory_space<vmem>>, vector<1x32xf32>
      %16 = vector.broadcast %15 : vector<1x32xf32> to vector<16x32xf32>
      %17 = arith.addf %14, %16 : vector<16x32xf32>
      %c0_14 = arith.constant 0 : index
      %c0_15 = arith.constant 0 : index
      %18 = vector.load %arg5[%c0_14, %c0_15] : memref<16x32xf32, #tpu.memory_space<vmem>>, vector<16x32xf32>
      %19 = arith.addf %17, %18 : vector<16x32xf32>
      %cst_16 = arith.constant dense<0.000000e+00> : vector<16xf32>
      %20 = vector.multi_reduction <add>, %19, %cst_16 [1] : vector<16x32xf32> to vector<16xf32>
      %21 = vector.shape_cast %20 : vector<16xf32> to vector<16x1xf32>
      %cst_17 = arith.constant 3.200000e+01 : f32
      %22 = vector.broadcast %cst_17 : f32 to vector<16x1xf32>
      %23 = arith.divf %21, %22 : vector<16x1xf32>
      %24 = vector.broadcast %23 : vector<16x1xf32> to vector<16x32xf32>
      %25 = arith.subf %19, %24 : vector<16x32xf32>
      %26 = arith.mulf %25, %25 : vector<16x32xf32>
      %cst_18 = arith.constant dense<0.000000e+00> : vector<16xf32>
      %27 = vector.multi_reduction <add>, %26, %cst_18 [1] : vector<16x32xf32> to vector<16xf32>
      %28 = vector.shape_cast %27 : vector<16xf32> to vector<16x1xf32>
      %cst_19 = arith.constant 3.200000e+01 : f32
      %29 = vector.broadcast %cst_19 : f32 to vector<16x1xf32>
      %30 = arith.divf %28, %29 : vector<16x1xf32>
      %31 = vector.broadcast %23 : vector<16x1xf32> to vector<16x32xf32>
      %32 = arith.subf %19, %31 : vector<16x32xf32>
      %cst_20 = arith.constant 9.99999974E-6 : f32
      %33 = vector.broadcast %cst_20 : f32 to vector<16x1xf32>
      %34 = arith.addf %30, %33 : vector<16x1xf32>
      %35 = math.rsqrt %34 : vector<16x1xf32>
      %36 = vector.broadcast %35 : vector<16x1xf32> to vector<16x32xf32>
      %37 = arith.mulf %32, %36 : vector<16x32xf32>
      %c0_21 = arith.constant 0 : index
      %c0_22 = arith.constant 0 : index
      %38 = vector.load %arg6[%c0_21, %c0_22] : memref<1x32xf32, #tpu.memory_space<vmem>>, vector<1x32xf32>
      %39 = vector.broadcast %38 : vector<1x32xf32> to vector<16x32xf32>
      %40 = arith.mulf %37, %39 : vector<16x32xf32>
      %c0_23 = arith.constant 0 : index
      %c0_24 = arith.constant 0 : index
      %41 = vector.load %arg7[%c0_23, %c0_24] : memref<1x32xf32, #tpu.memory_space<vmem>>, vector<1x32xf32>
      %42 = vector.broadcast %41 : vector<1x32xf32> to vector<16x32xf32>
      %43 = arith.addf %40, %42 : vector<16x32xf32>
      %c0_25 = arith.constant 0 : index
      %c0_26 = arith.constant 0 : index
      %44 = vector.load %arg8[%c0_25, %c0_26] : memref<16x32xf32, #tpu.memory_space<vmem>>, vector<16x32xf32>
      tpu.vector_store %arg8[%c0_25, %c0_26], %43 {strides = array<i32>} : memref<16x32xf32, #tpu.memory_space<vmem>>, vector<16x32xf32>,
    } else {
    }
    return
  }
  func.func @transform_0(%arg0: i32, %arg1: i32) -> (i32, i32) {
    %c0_i32 = arith.constant 0 : i32
    return %arg0, %arg1 : i32, i32
  }
  func.func @transform_1(%arg0: i32, %arg1: i32) -> (i32, i32) {
    %c0_i32 = arith.constant 0 : i32
    %c0_i32_0 = arith.constant 0 : i32
    return %arg1, %c0_i32 : i32, i32
  }
  func.func @transform_2(%arg0: i32, %arg1: i32) -> (i32, i32) {
    %c0_i32 = arith.constant 0 : i32
    %c0_i32_0 = arith.constant 0 : i32
    %c0_i32_1 = arith.constant 0 : i32
    return %c0_i32, %c0_i32_0 : i32, i32
  }
  func.func @transform_3(%arg0: i32, %arg1: i32) -> (i32, i32) {
    %c0_i32 = arith.constant 0 : i32
    %c0_i32_0 = arith.constant 0 : i32
    return %arg0, %c0_i32 : i32, i32
  }
  func.func @transform_4(%arg0: i32, %arg1: i32) -> (i32, i32) {
    %c0_i32 = arith.constant 0 : i32
    %c0_i32_0 = arith.constant 0 : i32
    %c0_i32_1 = arith.constant 0 : i32
    return %c0_i32, %c0_i32_0 : i32, i32
  }
  func.func @transform_5(%arg0: i32, %arg1: i32) -> (i32, i32) {
    %c0_i32 = arith.constant 0 : i32
    %c0_i32_0 = arith.constant 0 : i32
    %c0_i32_1 = arith.constant 0 : i32
    return %c0_i32, %c0_i32_0 : i32, i32
  }
  func.func @transform_6(%arg0: i32, %arg1: i32) -> (i32, i32) {
    %c0_i32 = arith.constant 0 : i32
    %c0_i32_0 = arith.constant 0 : i32
    return %arg0, %c0_i32 : i32, i32
  }
}

module attributes {stable_mosaic.version = 11 : i64} {
  func.func @_matmul_res_ln_kernel(%arg0: i32, %arg1: i32, %arg2: memref<16x64xf32, #tpu.memory_space<vmem>>, %arg3: memref<64x32xf32, #tpu.memory_space<vmem>>, %arg4: memref<1x32xf32, #tpu.memory_space<vmem>>, %arg5: memref<16x32xf32, #tpu.memory_space<vmem>>, %arg6: memref<1x32xf32, #tpu.memory_space<vmem>>, %arg7: memref<1x32xf32, #tpu.memory_space<vmem>>, %arg8: memref<16x32xf32, #tpu.memory_space<vmem>>, %arg9: memref<16x32xf32, #tpu.memory_space<vmem>>) attributes {dimension_semantics = [#tpu.dimension_semantics<parallel>, #tpu.dimension_semantics<arbitrary>], iteration_bounds = array<i64: 1, 1>, scalar_prefetch = 0 : i64, scratch_operands = 1 : i64, tpu.core_type = #tpu.core_type<tc>, window_params = [{transform_indices = @transform_0, window_bounds = array<i64: 16, 64>}, {transform_indices = @transform_1, window_bounds = array<i64: 64, 32>}, {pipeline_mode = #tpu.pipeline_mode<synchronous>, transform_indices = @transform_2, window_bounds = array<i64: 1, 32>}, {transform_indices = @transform_3, window_bounds = array<i64: 16, 32>}, {pipeline_mode = #tpu.pipeline_mode<synchronous>, transform_indices = @transform_4, window_bounds = array<i64: 1, 32>}, {pipeline_mode = #tpu.pipeline_mode<synchronous>, transform_indices = @transform_5, window_bounds = array<i64: 1, 32>}, {transform_indices = @transform_6, window_bounds = array<i64: 16, 32>}]} {
    %c0_i32 = arith.constant 0 : i32
    %0 = arith.cmpi eq, %arg1, %c0_i32 : i32
    %1 = arith.extui %0 : i1 to i32
    %c0_i32_0 = arith.constant 0 : i32
    %2 = arith.cmpi ne, %1, %c0_i32_0 : i32
    scf.if %2 {
      %cst_10 = arith.constant 0.000000e+00 : f32
      %14 = vector.broadcast %cst_10 : f32 to vector<16x32xf32>
      %c0_11 = arith.constant 0 : index
      %c0_12 = arith.constant 0 : index
      %15 = vector.load %arg9[%c0_11, %c0_12] : memref<16x32xf32, #tpu.memory_space<vmem>>, vector<16x32xf32>
      tpu.vector_store %arg9[%c0_11, %c0_12], %14 {strides = array<i32>} : memref<16x32xf32, #tpu.memory_space<vmem>>, vector<16x32xf32>,
    } else {
    }
    %c0 = arith.constant 0 : index
    %c0_1 = arith.constant 0 : index
    %3 = vector.load %arg9[%c0, %c0_1] : memref<16x32xf32, #tpu.memory_space<vmem>>, vector<16x32xf32>
    %c0_2 = arith.constant 0 : index
    %c0_3 = arith.constant 0 : index
    %4 = vector.load %arg2[%c0_2, %c0_3] : memref<16x64xf32, #tpu.memory_space<vmem>>, vector<16x64xf32>
    %5 = arith.truncf %4 : vector<16x64xf32> to vector<16x64xbf16>
    %c0_4 = arith.constant 0 : index
    %c0_5 = arith.constant 0 : index
    %6 = vector.load %arg3[%c0_4, %c0_5] : memref<64x32xf32, #tpu.memory_space<vmem>>, vector<64x32xf32>
    %7 = arith.truncf %6 : vector<64x32xf32> to vector<64x32xbf16>
    %cst = arith.constant dense<0.000000e+00> : vector<16x32xf32>
    %8 = tpu.matmul %5, %7, %cst {dimension_numbers = #tpu.dot_dimension_numbers<[1], [0], [0], [1], [0, 0, 1, 1], [], []>} : vector<16x64xbf16>, vector<64x32xbf16>, vector<16x32xf32> -> vector<16x32xf32>
    %9 = arith.addf %3, %8 : vector<16x32xf32>
    %c0_6 = arith.constant 0 : index
    %c0_7 = arith.constant 0 : index
    %10 = vector.load %arg9[%c0_6, %c0_7] : memref<16x32xf32, #tpu.memory_space<vmem>>, vector<16x32xf32>
    tpu.vector_store %arg9[%c0_6, %c0_7], %9 {strides = array<i32>} : memref<16x32xf32, #tpu.memory_space<vmem>>, vector<16x32xf32>,
    %c0_i32_8 = arith.constant 0 : i32
    %11 = arith.cmpi eq, %arg1, %c0_i32_8 : i32
    %12 = arith.extui %11 : i1 to i32
    %c0_i32_9 = arith.constant 0 : i32
    %13 = arith.cmpi ne, %12, %c0_i32_9 : i32
    scf.if %13 {
      %c0_10 = arith.constant 0 : index
      %c0_11 = arith.constant 0 : index
      %14 = vector.load %arg9[%c0_10, %c0_11] : memref<16x32xf32, #tpu.memory_space<vmem>>, vector<16x32xf32>
      %c0_12 = arith.constant 0 : index
      %c0_13 = arith.constant 0 : index
      %15 = vector.load %arg4[%c0_12, %c0_13] : memref<1x32xf32, #tpu.memory_space<vmem>>, vector<1x32xf32>
      %16 = vector.broadcast %15 : vector<1x32xf32> to vector<16x32xf32>
      %17 = arith.addf %14, %16 : vector<16x32xf32>
      %c0_14 = arith.constant 0 : index
      %c0_15 = arith.constant 0 : index
      %18 = vector.load %arg5[%c0_14, %c0_15] : memref<16x32xf32, #tpu.memory_space<vmem>>, vector<16x32xf32>
      %19 = arith.addf %17, %18 : vector<16x32xf32>
      %cst_16 = arith.constant dense<0.000000e+00> : vector<16xf32>
      %20 = vector.multi_reduction <add>, %19, %cst_16 [1] : vector<16x32xf32> to vector<16xf32>
      %21 = vector.shape_cast %20 : vector<16xf32> to vector<16x1xf32>
      %cst_17 = arith.constant 3.200000e+01 : f32
      %22 = vector.broadcast %cst_17 : f32 to vector<16x1xf32>
      %23 = arith.divf %21, %22 : vector<16x1xf32>
      %24 = vector.broadcast %23 : vector<16x1xf32> to vector<16x32xf32>
      %25 = arith.subf %19, %24 : vector<16x32xf32>
      %26 = arith.mulf %25, %25 : vector<16x32xf32>
      %cst_18 = arith.constant dense<0.000000e+00> : vector<16xf32>
      %27 = vector.multi_reduction <add>, %26, %cst_18 [1] : vector<16x32xf32> to vector<16xf32>
      %28 = vector.shape_cast %27 : vector<16xf32> to vector<16x1xf32>
      %cst_19 = arith.constant 3.200000e+01 : f32
      %29 = vector.broadcast %cst_19 : f32 to vector<16x1xf32>
      %30 = arith.divf %28, %29 : vector<16x1xf32>
      %31 = vector.broadcast %23 : vector<16x1xf32> to vector<16x32xf32>
      %32 = arith.subf %19, %31 : vector<16x32xf32>
      %cst_20 = arith.constant 9.99999974E-6 : f32
      %33 = vector.broadcast %cst_20 : f32 to vector<16x1xf32>
      %34 = arith.addf %30, %33 : vector<16x1xf32>
      %35 = math.rsqrt %34 : vector<16x1xf32>
      %36 = vector.broadcast %35 : vector<16x1xf32> to vector<16x32xf32>
      %37 = arith.mulf %32, %36 : vector<16x32xf32>
      %c0_21 = arith.constant 0 : index
      %c0_22 = arith.constant 0 : index
      %38 = vector.load %arg6[%c0_21, %c0_22] : memref<1x32xf32, #tpu.memory_space<vmem>>, vector<1x32xf32>
      %39 = vector.broadcast %38 : vector<1x32xf32> to vector<16x32xf32>
      %40 = arith.mulf %37, %39 : vector<16x32xf32>
      %c0_23 = arith.constant 0 : index
      %c0_24 = arith.constant 0 : index
      %41 = vector.load %arg7[%c0_23, %c0_24] : memref<1x32xf32, #tpu.memory_space<vmem>>, vector<1x32xf32>
      %42 = vector.broadcast %41 : vector<1x32xf32> to vector<16x32xf32>
      %43 = arith.addf %40, %42 : vector<16x32xf32>
      %c0_25 = arith.constant 0 : index
      %c0_26 = arith.constant 0 : index
      %44 = vector.load %arg8[%c0_25, %c0_26] : memref<16x32xf32, #tpu.memory_space<vmem>>, vector<16x32xf32>
      tpu.vector_store %arg8[%c0_25, %c0_26], %43 {strides = array<i32>} : memref<16x32xf32, #tpu.memory_space<vmem>>, vector<16x32xf32>,
    } else {
    }
    return
  }
  func.func @transform_0(%arg0: i32, %arg1: i32) -> (i32, i32) {
    %c0_i32 = arith.constant 0 : i32
    return %arg0, %arg1 : i32, i32
  }
  func.func @transform_1(%arg0: i32, %arg1: i32) -> (i32, i32) {
    %c0_i32 = arith.constant 0 : i32
    %c0_i32_0 = arith.constant 0 : i32
    return %arg1, %c0_i32 : i32, i32
  }
  func.func @transform_2(%arg0: i32, %arg1: i32) -> (i32, i32) {
    %c0_i32 = arith.constant 0 : i32
    %c0_i32_0 = arith.constant 0 : i32
    %c0_i32_1 = arith.constant 0 : i32
    return %c0_i32, %c0_i32_0 : i32, i32
  }
  func.func @transform_3(%arg0: i32, %arg1: i32) -> (i32, i32) {
    %c0_i32 = arith.constant 0 : i32
    %c0_i32_0 = arith.constant 0 : i32
    return %arg0, %c0_i32 : i32, i32
  }
  func.func @transform_4(%arg0: i32, %arg1: i32) -> (i32, i32) {
    %c0_i32 = arith.constant 0 : i32
    %c0_i32_0 = arith.constant 0 : i32
    %c0_i32_1 = arith.constant 0 : i32
    return %c0_i32, %c0_i32_0 : i32, i32
  }
  func.func @transform_5(%arg0: i32, %arg1: i32) -> (i32, i32) {
    %c0_i32 = arith.constant 0 : i32
    %c0_i32_0 = arith.constant 0 : i32
    %c0_i32_1 = arith.constant 0 : i32
    return %c0_i32, %c0_i32_0 : i32, i32
  }
  func.func @transform_6(%arg0: i32, %arg1: i32) -> (i32, i32) {
    %c0_i32 = arith.constant 0 : i32
    %c0_i32_0 = arith.constant 0 : i32
    return %arg0, %c0_i32 : i32, i32
  }
}

</mosaic_0001>

<bundles_post_ra>
// kernel: encoder_forward.10
= control target key start
LH: loop header
LB: loop body
LE: loop exit
PB: predicated region body
PF: predicated region fallthrough
CT: control target
= control target key end

     0   :  { %vm19_vm0 = vcmask 523264   ;;  %v118_v0 = vmov 0.0   ;;  %vm119_vm1 = vmmov 0   ;;  %vm33_vm2 = vcmask 261120   ;;  %s173_s1 = inlined_call_operand.vmem [shape: f32[32,64], index: 1, kind: input, shape index: {}]   ;;  %s174_s0 = inlined_call_operand.vmem [shape: f32[16,32], index: 0, kind: input, shape index: {}]   ;;  %s175_s2 = inlined_call_operand.vmem [shape: f32[1,64], index: 2, kind: input, shape index: {}]   ;;  %s176_s3 = inlined_call_operand.vmem [shape: f32[16,64], index: 3, kind: output, shape index: {}]  }
   0x1   :  { %108 = vmatprep.subr.bf16.mxu0 %v118_v0  ;;  %v29_v1 = vld [vmem:[%s173_s1 + $0x10] sm:$0xff]  ;;  %v30_v2 = vld [vmem:[%s173_s1 + $0x18] sm:$0xff]  ;;  %v27_v3 = vld [vmem:[%s173_s1] sm:$0xff]  ;;  %112 = vmatprep.mubr.msk.bf16.mxu0 %vm119_vm1, %v118_v0  ;;  %20 = vst.msk [vmem:[#allocation2] sm:$0xff] %vm19_vm0, %v118_v0 }
   0x2   :  { %21 = vst.msk [vmem:[#allocation2 + $0x8] sm:$0xff] %vm19_vm0, %v118_v0  ;;  %v32_v4 = vpack.c.bf16 %v30_v2, %v29_v1  ;;  %v28_v5 = vld [vmem:[%s173_s1 + $0x8] sm:$0xff]  ;;  %v24_v7 = vld [vmem:[%s174_s0] sm:$0xff] }
   0x3   :  { %v31_v6 = vpack.c.bf16 %v28_v5, %v27_v3  ;;  %v25_v8 = vld [vmem:[%s174_s0 + $0x8] sm:$0xff]  ;;  %v104_v18 = vld [vmem:[%s175_s2] ss:$0 sm:$0xff] }
   0x4   :  { %109 = vmatpush3.bf16.msra.mxu0 %v32_v4  ;;  %v26_v9 = vpack.c.bf16 %v25_v8, %v24_v7 }
   0x5   :  { %110 = vmatprep.subr.bf16.mxu0 %v118_v0 }
   0x8   :  { %111 = vmatpush3.bf16.msra.mxu0 %v31_v6  ;;  %v22_v10 = vld [vmem:[#allocation2] sm:$0xff] }
   0x9   :  { %v23_v14 = vld [vmem:[#allocation2 + $0x8] sm:$0xff] }
   0xb   :  { %113 = vmatmul.mubr.msk.bf16.vlgmr.msra.gmra.mxu0 %vm33_vm2, %v26_v9 }
  0xcb   :  { %v71_v11 = vpop.f32.mrf.mxu0 }
  0xcc   :  { %v78_v12 = vadd.f32 %v71_v11, %v22_v10 }
  0xcd   :  { %v114_v13 = vpop.f32.mrf.mxu0 }
  0xce   :  { %81 = vst.msk [vmem:[#allocation2] sm:$0xff] %vm19_vm0, %v78_v12 }
  0xcf   :  { %v74_v15 = vpop.f32.mrf.mxu0 }
  0xd0   :  { %v79_v16 = vadd.f32 %v74_v15, %v23_v14 }
  0xd1   :  { %v115_v17 = vpop.f32.mrf.mxu0 }
  0xd2   :  { %82 = vst.msk [vmem:[#allocation2 + $0x8] sm:$0xff] %vm19_vm0, %v79_v16 }
  0xd5   :  { %v86_v19 = vld [vmem:[#allocation2] sm:$0xff] }
  0xd6   :  { %v95_v20 = vadd.f32 %v104_v18, %v86_v19 }
  0xd8   :  { %97 = vst.msk [vmem:[%s176_s3] sm:$0xff] %vm19_vm0, %v95_v20 }
  0xd9   :  { %v87_v21 = vld [vmem:[#allocation2 + $0x8] sm:$0xff] }
  0xda   :  { %v96_v22 = vadd.f32 %v104_v18, %v87_v21 }
  0xdc   :  { %98 = vst.msk [vmem:[%s176_s3 + $0x8] sm:$0xff] %vm19_vm0, %v96_v22 }

// kernel: encoder_forward.11
= control target key start
LH: loop header
LB: loop body
LE: loop exit
PB: predicated region body
PF: predicated region fallthrough
CT: control target
= control target key end

     0   :  { %s809_s9 = smov 0   ;;  %s902_s0 = inlined_call_operand.vmem [shape: f32[2,4,8,8], index: 0, kind: input, shape index: {}]   ;;  %s903_s1 = inlined_call_operand.vmem [shape: f32[2,4,8,8], index: 1, kind: input, shape index: {}]   ;;  %s904_s2 = inlined_call_operand.vmem [shape: f32[2,4,8,8], index: 2, kind: output, shape index: {}]  }
   0x1 LB: > { %s670_s10 = sadd.s32 4294967295, %s790_s9   ;;  %p674_p0 = scmp.ge.s32.totalorder %s790_s9, 1  ;;  %s790_s9 = sphi %s809_s9, %s12_s9  }
   0x2   : > { %p122_p1 = scmp.lt.s32.totalorder %s790_s9, 3 }
   0x4   : > { %p123_p2 = pnand %p674_p0, %p122_p1 }
   0x5   : > { %p149_p3 = scmp.lt.s32.totalorder (!%p123_p2), %s670_s10, 1 }
   0x6   : > { %126 = sbr.rel (%p123_p2) target bundleno = 745 (0x2e9), region = 28 }
   0xb   : > { %v792_v0 = vmov 0.0   ;;  %s906_s10 = smov (!%p149_p3, %s670_s10), 1  ;;  %vm793_vm0 = vmmov 0   ;;  %vm181_vm1 = vcmask 64512   ;;  %vm421_vm2 = vcmask 1043456  }
   0xc   : > { %710 = vmatprep.subr.bf16.mxu0 %v792_v0  ;;  %716 = vmatprep.subr.bf16.mxu1 %v792_v0  ;;  %s823_s11 = sshll.u32 %s906_s10, 5 }
   0xd   : > { %712 = vmatprep.mubr.msk.bf16.mxu0 %vm793_vm0, %v792_v0  ;;  %718 = vmatprep.mubr.msk.bf16.mxu1 %vm793_vm0, %v792_v0  ;;  %s158_s14 = scalar_lea.vmem %s903_s1, %s823_s11  ;;  %s153_s17 = scalar_lea.vmem %s902_s0, %s823_s11 }
   0xe   : > { %v169_v1 = vld [vmem:[%s158_s14] sm:$0xff]  ;;  %v170_v2 = vld [vmem:[%s158_s14 + $0x8] sm:$0xff]  ;;  %v171_v5 = vld [vmem:[%s158_s14 + $0x10] sm:$0xff]  ;;  %s163_s20 = scalar_lea.vmem %s904_s2, %s823_s11 }
   0xf   : > { %v177_v3 = vpack.c.bf16 %v169_v1, %v169_v1  ;;  %v178_v4 = vpack.c.bf16 %v170_v2, %v170_v2  ;;  %v172_v6 = vld [vmem:[%s158_s14 + $0x18] sm:$0xff]  ;;  %v165_v9 = vld [vmem:[%s153_s17] sm:$0xff]  ;;  %v166_v10 = vld [vmem:[%s153_s17 + $0x8] sm:$0xff]  ;;  %v179_v11 = vpack.c.bf16 %v171_v5, %v171_v5 }
  0x10   : > { %v180_v12 = vpack.c.bf16 %v172_v6, %v172_v6  ;;  %v837_v13 = vpack.c.bf16 %v165_v9, %v165_v9  ;;  %v839_v14 = vpack.c.bf16 %v166_v10, %v166_v10  ;;  %v167_v17 = vld [vmem:[%s153_s17 + $0x10] sm:$0xff]  ;;  %v168_v18 = vld [vmem:[%s153_s17 + $0x18] sm:$0xff] }
  0x11   : > { %v186_v7 = vsel %vm181_vm1, %v177_v3, 0  ;;  %v232_v8 = vsel %vm181_vm1, %v178_v4, 0  ;;  %v278_v15 = vsel %vm181_vm1, %v179_v11, 0  ;;  %v853_v19 = vpack.c.bf16 %v167_v17, %v167_v17 }
  0x12   : > { %711 = vmatpush3.bf16.xpose.msra.mxu0 %v186_v7  ;;  %717 = vmatpush3.bf16.xpose.msra.mxu1 %v232_v8  ;;  %v324_v16 = vsel %vm181_vm1, %v180_v12, 0  ;;  %v855_v20 = vpack.c.bf16 %v168_v18, %v168_v18  ;;  %v422_v2 = vsel %vm421_vm2, %v837_v13, 0  ;;  %v467_v3 = vsel %vm421_vm2, %v839_v14, 0 }
  0x13   : > { %722 = vmatprep.subr.bf16.mxu0 %v792_v0  ;;  %728 = vmatprep.subr.bf16.mxu1 %v792_v0  ;;  %v512_v11 = vsel %vm421_vm2, %v853_v19, 0 }
  0x19   : > { %713 = vmatmul.mubr.msk.bf16.vlgmr.msra.gmra.mxu0 %vm181_vm1, %v837_v13  ;;  %719 = vmatmul.mubr.msk.bf16.vlgmr.msra.gmra.mxu1 %vm181_vm1, %v839_v14 }
  0x1a   : > { %723 = vmatpush3.bf16.xpose.msra.mxu0 %v278_v15  ;;  %729 = vmatpush3.bf16.xpose.msra.mxu1 %v324_v16  ;;  %v557_v15 = vsel %vm421_vm2, %v855_v20, 0 }
  0x1b   : > { %724 = vmatprep.mubr.msk.bf16.mxu0 %vm793_vm0, %v792_v0  ;;  %730 = vmatprep.mubr.msk.bf16.mxu1 %vm793_vm0, %v792_v0 }
  0x1c   : > { %734 = vmatprep.subr.bf16.mxu0 %v792_v0  ;;  %740 = vmatprep.subr.bf16.mxu1 %v792_v0 }
  0x21   : > { %725 = vmatmul.mubr.msk.bf16.vlgmr.msra.gmra.mxu0 %vm181_vm1, %v853_v19  ;;  %731 = vmatmul.mubr.msk.bf16.vlgmr.msra.gmra.mxu1 %vm181_vm1, %v855_v20 }
  0x22   : > { %736 = vmatprep.mubr.msk.bf16.mxu0 %vm793_vm0, %v792_v0  ;;  %742 = vmatprep.mubr.msk.bf16.mxu1 %vm793_vm0, %v792_v0 }
  0x23   : > { %735 = vmatpush3.bf16.msra.mxu0 %v422_v2  ;;  %741 = vmatpush3.bf16.msra.mxu1 %v467_v3 }
  0x24   : > { %746 = vmatprep.subr.bf16.mxu0 %v792_v0  ;;  %752 = vmatprep.subr.bf16.mxu1 %v792_v0 }
  0xd9   : > { %v222_v21 = vpop.f32.mrf.mxu0  ;;  %v268_v22 = vpop.f32.mrf.mxu1 }
  0xda   : > { %v366_v23 = vmul.f32 0.35355338, %v222_v21  ;;  %v367_v24 = vmul.f32 0.35355338, %v268_v22 }
  0xdb   : > { %v714_v25 = vpop.f32.mrf.mxu0  ;;  %v720_v26 = vpop.f32.mrf.mxu1 }
  0xdc   : > { %v370_v27 = vsel %vm181_vm1, %v366_v23, -inf  ;;  %v373_v30 = vsel %vm181_vm1, %v367_v24, -inf }
  0xdd   : > { %v271_v28 = vpop.f32.mrf.mxu1  ;;  %371 = vmax.xlane.f32.xlu0 %v370_v27  ;;  %v225_v29 = vpop.f32.mrf.mxu0 }
  0xdf   : > { %v715_v31 = vpop.f32.mrf.mxu0  ;;  %v721_v32 = vpop.f32.mrf.mxu1 }
  0xe1   : > { %v360_v33 = vpop.f32.mrf.mxu1  ;;  %374 = vmax.xlane.f32.xlu0 %v373_v30  ;;  %v314_v34 = vpop.f32.mrf.mxu0 }
  0xe2   : > { %v369_v35 = vmul.f32 0.35355338, %v360_v33  ;;  %v368_v36 = vmul.f32 0.35355338, %v314_v34 }
  0xe3   : > { %v726_v37 = vpop.f32.mrf.mxu0  ;;  %v732_v38 = vpop.f32.mrf.mxu1 }
  0xe4   : > { %v376_v39 = vsel %vm181_vm1, %v368_v36, -inf  ;;  %v379_v42 = vsel %vm181_vm1, %v369_v35, -inf }
  0xe5   : > { %v363_v40 = vpop.f32.mrf.mxu1  ;;  %377 = vmax.xlane.f32.xlu1 %v376_v39  ;;  %v317_v41 = vpop.f32.mrf.mxu0 }
  0xe7   : > { %v727_v43 = vpop.f32.mrf.mxu0  ;;  %v733_v44 = vpop.f32.mrf.mxu1 }
  0xe9   : > { %380 = vmax.xlane.f32.xlu1 %v379_v42 }
 0x166   : > { %v372_v45 = vpop.xlane.xlu0 %371 }
 0x167   : > { %v382_v46 = vsub.f32 %v366_v23, %v372_v45 }
 0x169   : > { %v386_v47 = vmul.f32 1.442695, %v382_v46 }
 0x16a   : > { %v375_v48 = vpop.xlane.xlu0 %374 }
 0x16b   : > { %768 = vpow2.f32 %v386_v47  ;;  %v383_v49 = vsub.f32 %v367_v24, %v375_v48 }
 0x16d   : > { %v388_v50 = vmul.f32 1.442695, %v383_v49 }
 0x16e   : > { %v378_v51 = vpop.xlane.xlu1 %377 }
 0x16f   : > { %770 = vpow2.f32 %v388_v50  ;;  %v384_v52 = vsub.f32 %v368_v36, %v378_v51 }
 0x171   : > { %v390_v53 = vmul.f32 1.442695, %v384_v52 }
 0x172   : > { %v381_v54 = vpop.xlane.xlu1 %380 }
 0x173   : > { %772 = vpow2.f32 %v390_v53  ;;  %v385_v55 = vsub.f32 %v369_v35, %v381_v54 }
 0x175   : > { %v392_v56 = vmul.f32 1.442695, %v385_v55 }
 0x177   : > { %774 = vpow2.f32 %v392_v56 }
 0x178   : > { %v769_v57 = vpop.eup %768 }
 0x179   : > { %v394_v58 = vsel %vm181_vm1, %v769_v57, 0.0 }
 0x17a   : > { %395 = vadd.xlane.f32.xlu0 %v394_v58 }
 0x17c   : > { %v771_v59 = vpop.eup %770 }
 0x17d   : > { %v397_v60 = vsel %vm181_vm1, %v771_v59, 0.0 }
 0x17e   : > { %398 = vadd.xlane.f32.xlu1 %v397_v60 }
 0x180   : > { %v773_v61 = vpop.eup %772 }
 0x181   : > { %v400_v62 = vsel %vm181_vm1, %v773_v61, 0.0 }
 0x182   : > { %401 = vadd.xlane.f32.xlu0 %v400_v62 }
 0x184   : > { %v775_v63 = vpop.eup %774 }
 0x185   : > { %v403_v1 = vsel %vm181_vm1, %v775_v63, 0.0 }
 0x186   : > { %404 = vadd.xlane.f32.xlu1 %v403_v1 }
 0x203   : > { %v396_v4 = vpop.xlane.xlu0 %395 }
 0x204   : > { %776 = vrcp.f32 %v396_v4 }
 0x207   : > { %v399_v5 = vpop.xlane.xlu1 %398 }
 0x208   : > { %778 = vrcp.f32 %v399_v5 }
 0x20b   : > { %v402_v6 = vpop.xlane.xlu0 %401 }
 0x20c   : > { %780 = vrcp.f32 %v402_v6 }
 0x20f   : > { %v405_v7 = vpop.xlane.xlu1 %404 }
 0x210   : > { %782 = vrcp.f32 %v405_v7 }
 0x211   : > { %v777_v8 = vpop.eup %776 }
 0x212   : > { %v410_v9 = vmul.f32 %v777_v8, %v769_v57 }
 0x214   : > { %v414_v10 = vpack.c.bf16 %v410_v9, %v410_v9 }
 0x215   : > { %v779_v12 = vpop.eup %778 }
 0x216   : > { %737 = vmatmul.mubr.msk.bf16.vlgmr.msra.gmra.mxu0 %vm181_vm1, %v414_v10  ;;  %v411_v13 = vmul.f32 %v779_v12, %v771_v59 }
 0x217   : > { %747 = vmatpush3.bf16.msra.mxu0 %v512_v11  ;;  %748 = vmatprep.mubr.msk.bf16.mxu0 %vm793_vm0, %v792_v0 }
 0x218   : > { %v415_v14 = vpack.c.bf16 %v411_v13, %v411_v13 }
 0x219   : > { %v781_v16 = vpop.eup %780 }
 0x21a   : > { %743 = vmatmul.mubr.msk.bf16.vlgmr.msra.gmra.mxu1 %vm181_vm1, %v415_v14  ;;  %v412_v17 = vmul.f32 %v781_v16, %v773_v61 }
 0x21b   : > { %753 = vmatpush3.bf16.msra.mxu1 %v557_v15  ;;  %754 = vmatprep.mubr.msk.bf16.mxu1 %vm793_vm0, %v792_v0 }
 0x21c   : > { %v416_v18 = vpack.c.bf16 %v412_v17, %v412_v17 }
 0x21d   : > { %v783_v19 = vpop.eup %782 }
 0x21e   : > { %749 = vmatmul.mubr.msk.bf16.vlgmr.msra.gmra.mxu0 %vm181_vm1, %v416_v18  ;;  %v413_v21 = vmul.f32 %v783_v19, %v775_v63 }
 0x220   : > { %v417_v22 = vpack.c.bf16 %v413_v21, %v413_v21 }
 0x222   : > { %755 = vmatmul.mubr.msk.bf16.vlgmr.msra.gmra.mxu1 %vm181_vm1, %v417_v22 }
 0x2d6   : > { %v458_v20 = vpop.f32.mrf.mxu0 }
 0x2d7   : > { %599 = vst.msk [vmem:[%s163_s20] sm:$0xff] %vm181_vm1, %v458_v20 }
 0x2d8   : > { %v738_v23 = vpop.f32.mrf.mxu0 }
 0x2da   : > { %v461_v24 = vpop.f32.mrf.mxu0  ;;  %v503_v25 = vpop.f32.mrf.mxu1 }
 0x2db   : > { %600 = vst.msk [vmem:[%s163_s20 + $0x8] sm:$0xff] %vm181_vm1, %v503_v25 }
 0x2dc   : > { %v739_v0 = vpop.f32.mrf.mxu0  ;;  %v744_v26 = vpop.f32.mrf.mxu1 }
 0x2de   : > { %v506_v27 = vpop.f32.mrf.mxu1  ;;  %v548_v28 = vpop.f32.mrf.mxu0 }
 0x2df   : > { %601 = vst.msk [vmem:[%s163_s20 + $0x10] sm:$0xff] %vm181_vm1, %v548_v28 }
 0x2e0   : > { %v745_v29 = vpop.f32.mrf.mxu1  ;;  %v750_v30 = vpop.f32.mrf.mxu0 }
 0x2e2   : > { %v551_v31 = vpop.f32.mrf.mxu0  ;;  %v593_v32 = vpop.f32.mrf.mxu1 }
 0x2e3   : > { %602 = vst.msk [vmem:[%s163_s20 + $0x18] sm:$0xff] %vm181_vm1, %v593_v32 }
 0x2e4   : > { %v751_v33 = vpop.f32.mrf.mxu0  ;;  %v756_v34 = vpop.f32.mrf.mxu1 }
 0x2e6   : > { %v596_v35 = vpop.f32.mrf.mxu1 }
 0x2e8   : > { %v757_v36 = vpop.f32.mrf.mxu1 }
 0x2e9 PF: > { %s12_s9 = sadd.s32 1, %s790_s9  }
 0x2ea   : > { %p9_p4 = scmp.ge.s32.totalorder %s12_s9, 4  }
 0x2ec   :  { %11 = sbr.rel (!%p9_p4) target bundleno = 1 (0x1), region = 61 }

// kernel: encoder_forward.12
= control target key start
LH: loop header
LB: loop body
LE: loop exit
PB: predicated region body
PF: predicated region fallthrough
CT: control target
= control target key end

     0   :  { %vm28_vm0 = vcmask 261120   ;;  %v181_v0 = vmov 0.0   ;;  %vm182_vm1 = vmmov 0   ;;  %s268_s1 = inlined_call_operand.vmem [shape: f32[32,32], index: 1, kind: input, shape index: {}]   ;;  %s269_s0 = inlined_call_operand.vmem [shape: f32[16,32], index: 0, kind: input, shape index: {}]   ;;  %s270_s2 = inlined_call_operand.vmem [shape: f32[1,32], index: 2, kind: input, shape index: {}]   ;;  %s271_s3 = inlined_call_operand.vmem [shape: f32[16,32], index: 3, kind: input, shape index: {}]   ;;  %s272_s4 = inlined_call_operand.vmem [shape: f32[1,32], index: 4, kind: input, shape index: {}]   ;;  %s273_s5 = inlined_call_operand.vmem [shape: f32[1,32], index: 5, kind: input, shape index: {}]   ;;  %s274_s6 = inlined_call_operand.vmem [shape: f32[16,32], index: 6, kind: output, shape index: {}]  }
   0x1   :  { %167 = vmatprep.subr.bf16.mxu0 %v181_v0  ;;  %v38_v1 = vld [vmem:[%s268_s1 + $0x10] sm:$0xff]  ;;  %v39_v2 = vld [vmem:[%s268_s1 + $0x18] sm:$0xff]  ;;  %v36_v3 = vld [vmem:[%s268_s1] sm:$0xff]  ;;  %171 = vmatprep.mubr.msk.bf16.mxu0 %vm182_vm1, %v181_v0  ;;  %29 = vst.msk [vmem:[#allocation2] sm:$0xff] %vm28_vm0, %v181_v0 }
   0x2   :  { %30 = vst.msk [vmem:[#allocation2 + $0x8] sm:$0xff] %vm28_vm0, %v181_v0  ;;  %v41_v4 = vpack.c.bf16 %v39_v2, %v38_v1  ;;  %v37_v5 = vld [vmem:[%s268_s1 + $0x8] sm:$0xff]  ;;  %v33_v7 = vld [vmem:[%s269_s0] sm:$0xff] }
   0x3   :  { %v40_v6 = vpack.c.bf16 %v37_v5, %v36_v3  ;;  %v34_v8 = vld [vmem:[%s269_s0 + $0x8] sm:$0xff]  ;;  %v161_v18 = vld [vmem:[%s270_s2] ss:$0 sm:$0xff] }
   0x4   :  { %168 = vmatpush3.bf16.msra.mxu0 %v41_v4  ;;  %v35_v9 = vpack.c.bf16 %v34_v8, %v33_v7  ;;  %v105_v20 = vld [vmem:[%s271_s3] sm:$0xff]  ;;  %v106_v24 = vld [vmem:[%s271_s3 + $0x8] sm:$0xff] }
   0x5   :  { %169 = vmatprep.subr.bf16.mxu0 %v181_v0  ;;  %v162_v46 = vld [vmem:[%s272_s4] ss:$0 sm:$0xff] }
   0x6   :  { %v163_v48 = vld [vmem:[%s273_s5] ss:$0 sm:$0xff] }
   0x8   :  { %170 = vmatpush3.bf16.msra.mxu0 %v40_v6  ;;  %v31_v10 = vld [vmem:[#allocation2] sm:$0xff] }
   0x9   :  { %v32_v14 = vld [vmem:[#allocation2 + $0x8] sm:$0xff] }
   0xb   :  { %172 = vmatmul.mubr.msk.bf16.vlgmr.msra.gmra.mxu0 %vm28_vm0, %v35_v9 }
  0xcb   :  { %v80_v11 = vpop.f32.mrf.mxu0 }
  0xcc   :  { %v87_v12 = vadd.f32 %v80_v11, %v31_v10 }
  0xcd   :  { %v173_v13 = vpop.f32.mrf.mxu0 }
  0xce   :  { %89 = vst.msk [vmem:[#allocation2] sm:$0xff] %vm28_vm0, %v87_v12 }
  0xcf   :  { %v83_v15 = vpop.f32.mrf.mxu0 }
  0xd0   :  { %v88_v16 = vadd.f32 %v83_v15, %v32_v14 }
  0xd1   :  { %v174_v17 = vpop.f32.mrf.mxu0 }
  0xd2   :  { %90 = vst.msk [vmem:[#allocation2 + $0x8] sm:$0xff] %vm28_vm0, %v88_v16 }
  0xd5   :  { %v94_v19 = vld [vmem:[#allocation2] sm:$0xff] }
  0xd6   :  { %v103_v21 = vadd.f32 %v161_v18, %v94_v19 }
  0xd8   :  { %v107_v22 = vadd.f32 %v105_v20, %v103_v21 }
  0xd9   :  { %v95_v23 = vld [vmem:[#allocation2 + $0x8] sm:$0xff] }
  0xda   :  { %v109_v25 = vsel %vm28_vm0, %v107_v22, 0.0  ;;  %v104_v26 = vadd.f32 %v161_v18, %v95_v23 }
  0xdb   :  { %110 = vadd.xlane.f32.xlu0 %v109_v25 }
  0xdc   :  { %v108_v27 = vadd.f32 %v106_v24, %v104_v26 }
  0xde   :  { %v112_v28 = vsel %vm28_vm0, %v108_v27, 0.0 }
  0xdf   :  { %113 = vadd.xlane.f32.xlu0 %v112_v28 }
 0x164   :  { %v111_v29 = vpop.xlane.xlu0 %110 }
 0x165   :  { %v116_v30 = vmul.f32 0.03125, %v111_v29 }
 0x167   :  { %v118_v31 = vsub.f32 %v107_v22, %v116_v30 }
 0x168   :  { %v114_v32 = vpop.xlane.xlu0 %113 }
 0x169   :  { %v117_v33 = vmul.f32 0.03125, %v114_v32  ;;  %v120_v34 = vmul.f32 %v118_v31, %v118_v31 }
 0x16b   :  { %v119_v35 = vsub.f32 %v108_v27, %v117_v33  ;;  %v122_v36 = vsel %vm28_vm0, %v120_v34, 0.0 }
 0x16c   :  { %123 = vadd.xlane.f32.xlu1 %v122_v36 }
 0x16d   :  { %v121_v37 = vmul.f32 %v119_v35, %v119_v35 }
 0x16f   :  { %v125_v38 = vsel %vm28_vm0, %v121_v37, 0.0 }
 0x170   :  { %126 = vadd.xlane.f32.xlu1 %v125_v38 }
 0x1f5   :  { %v124_v39 = vpop.xlane.xlu1 %123 }
 0x1f6   :  { %v128_v40 = vmul.f32 0.03125, %v124_v39 }
 0x1f8   :  { %v130_v41 = vadd.f32 1e-05, %v128_v40 }
 0x1f9   :  { %v127_v42 = vpop.xlane.xlu1 %126 }
 0x1fa   :  { %177 = vrsqrt.f32 %v130_v41  ;;  %v129_v43 = vmul.f32 0.03125, %v127_v42 }
 0x1fc   :  { %v131_v44 = vadd.f32 1e-05, %v129_v43 }
 0x1fe   :  { %179 = vrsqrt.f32 %v131_v44 }
 0x207   :  { %v178_v45 = vpop.eup %177 }
 0x208   :  { %v134_v47 = vmul.f32 %v178_v45, %v118_v31 }
 0x20a   :  { %v143_v49 = vmul.f32 %v162_v46, %v134_v47 }
 0x20b   :  { %v180_v50 = vpop.eup %179 }
 0x20c   :  { %v152_v51 = vadd.f32 %v163_v48, %v143_v49  ;;  %v135_v52 = vmul.f32 %v180_v50, %v119_v35 }
 0x20e   :  { %154 = vst.msk [vmem:[%s274_s6] sm:$0xff] %vm28_vm0, %v152_v51  ;;  %v144_v53 = vmul.f32 %v162_v46, %v135_v52 }
 0x210   :  { %v153_v54 = vadd.f32 %v163_v48, %v144_v53 }
 0x212   :  { %155 = vst.msk [vmem:[%s274_s6 + $0x8] sm:$0xff] %vm28_vm0, %v153_v54 }

// kernel: encoder_forward.13
= control target key start
LH: loop header
LB: loop body
LE: loop exit
PB: predicated region body
PF: predicated region fallthrough
CT: control target
= control target key end

     0   :  { %vm19_vm0 = vcmask 523264   ;;  %v120_v0 = vmov 0.0   ;;  %vm121_vm1 = vmmov 0   ;;  %vm33_vm2 = vcmask 261120   ;;  %s175_s1 = inlined_call_operand.vmem [shape: f32[32,64], index: 1, kind: input, shape index: {}]   ;;  %s176_s0 = inlined_call_operand.vmem [shape: f32[16,32], index: 0, kind: input, shape index: {}]   ;;  %s177_s2 = inlined_call_operand.vmem [shape: f32[1,64], index: 2, kind: input, shape index: {}]   ;;  %s178_s3 = inlined_call_operand.vmem [shape: f32[16,64], index: 3, kind: output, shape index: {}]  }
   0x1   :  { %110 = vmatprep.subr.bf16.mxu0 %v120_v0  ;;  %v29_v1 = vld [vmem:[%s175_s1 + $0x10] sm:$0xff]  ;;  %v30_v2 = vld [vmem:[%s175_s1 + $0x18] sm:$0xff]  ;;  %v27_v3 = vld [vmem:[%s175_s1] sm:$0xff]  ;;  %114 = vmatprep.mubr.msk.bf16.mxu0 %vm121_vm1, %v120_v0  ;;  %20 = vst.msk [vmem:[#allocation2] sm:$0xff] %vm19_vm0, %v120_v0 }
   0x2   :  { %21 = vst.msk [vmem:[#allocation2 + $0x8] sm:$0xff] %vm19_vm0, %v120_v0  ;;  %v32_v4 = vpack.c.bf16 %v30_v2, %v29_v1  ;;  %v28_v5 = vld [vmem:[%s175_s1 + $0x8] sm:$0xff]  ;;  %v24_v7 = vld [vmem:[%s176_s0] sm:$0xff] }
   0x3   :  { %v31_v6 = vpack.c.bf16 %v28_v5, %v27_v3  ;;  %v25_v8 = vld [vmem:[%s176_s0 + $0x8] sm:$0xff]  ;;  %v106_v18 = vld [vmem:[%s177_s2] ss:$0 sm:$0xff] }
   0x4   :  { %111 = vmatpush3.bf16.msra.mxu0 %v32_v4  ;;  %v26_v9 = vpack.c.bf16 %v25_v8, %v24_v7 }
   0x5   :  { %112 = vmatprep.subr.bf16.mxu0 %v120_v0 }
   0x8   :  { %113 = vmatpush3.bf16.msra.mxu0 %v31_v6  ;;  %v22_v10 = vld [vmem:[#allocation2] sm:$0xff] }
   0x9   :  { %v23_v14 = vld [vmem:[#allocation2 + $0x8] sm:$0xff] }
   0xb   :  { %115 = vmatmul.mubr.msk.bf16.vlgmr.msra.gmra.mxu0 %vm33_vm2, %v26_v9 }
  0xcb   :  { %v71_v11 = vpop.f32.mrf.mxu0 }
  0xcc   :  { %v78_v12 = vadd.f32 %v71_v11, %v22_v10 }
  0xcd   :  { %v116_v13 = vpop.f32.mrf.mxu0 }
  0xce   :  { %81 = vst.msk [vmem:[#allocation2] sm:$0xff] %vm19_vm0, %v78_v12 }
  0xcf   :  { %v74_v15 = vpop.f32.mrf.mxu0 }
  0xd0   :  { %v79_v16 = vadd.f32 %v74_v15, %v23_v14 }
  0xd1   :  { %v117_v17 = vpop.f32.mrf.mxu0 }
  0xd2   :  { %82 = vst.msk [vmem:[#allocation2 + $0x8] sm:$0xff] %vm19_vm0, %v79_v16 }
  0xd5   :  { %v86_v19 = vld [vmem:[#allocation2] sm:$0xff] }
  0xd6   :  { %v95_v20 = vadd.f32 %v106_v18, %v86_v19 }
  0xd8   :  { %v97_v21 = vmax.f32 %v95_v20, 0.0 }
  0xd9   :  { %v87_v22 = vld [vmem:[#allocation2 + $0x8] sm:$0xff] }
  0xda   :  { %99 = vst.msk [vmem:[%s178_s3] sm:$0xff] %vm19_vm0, %v97_v21  ;;  %v96_v23 = vadd.f32 %v106_v18, %v87_v22 }
  0xdc   :  { %v98_v24 = vmax.f32 %v96_v23, 0.0 }
  0xde   :  { %100 = vst.msk [vmem:[%s178_s3 + $0x8] sm:$0xff] %vm19_vm0, %v98_v24 }

// kernel: encoder_forward.14
= control target key start
LH: loop header
LB: loop body
LE: loop exit
PB: predicated region body
PF: predicated region fallthrough
CT: control target
= control target key end

     0   :  { %vm28_vm0 = vcmask 261120   ;;  %v194_v0 = vmov 0.0   ;;  %vm195_vm1 = vmmov 0   ;;  %vm48_vm2 = vcmask 523264   ;;  %s292_s1 = inlined_call_operand.vmem [shape: f32[64,32], index: 1, kind: input, shape index: {}]   ;;  %s293_s0 = inlined_call_operand.vmem [shape: f32[16,64], index: 0, kind: input, shape index: {}]   ;;  %s294_s2 = inlined_call_operand.vmem [shape: f32[1,32], index: 2, kind: input, shape index: {}]   ;;  %s295_s3 = inlined_call_operand.vmem [shape: f32[16,32], index: 3, kind: input, shape index: {}]   ;;  %s296_s4 = inlined_call_operand.vmem [shape: f32[1,32], index: 4, kind: input, shape index: {}]   ;;  %s297_s5 = inlined_call_operand.vmem [shape: f32[1,32], index: 5, kind: input, shape index: {}]   ;;  %s298_s6 = inlined_call_operand.vmem [shape: f32[16,32], index: 6, kind: output, shape index: {}]  }
   0x1   :  { %176 = vmatprep.subr.bf16.mxu0 %v194_v0  ;;  %v42_v1 = vld [vmem:[%s292_s1 + $0x30] sm:$0xff]  ;;  %v43_v2 = vld [vmem:[%s292_s1 + $0x38] sm:$0xff]  ;;  %v40_v3 = vld [vmem:[%s292_s1 + $0x20] sm:$0xff]  ;;  %184 = vmatprep.mubr.msk.bf16.mxu0 %vm195_vm1, %v194_v0  ;;  %29 = vst.msk [vmem:[#allocation2] sm:$0xff] %vm28_vm0, %v194_v0 }
   0x2   :  { %30 = vst.msk [vmem:[#allocation2 + $0x8] sm:$0xff] %vm28_vm0, %v194_v0  ;;  %v47_v4 = vpack.c.bf16 %v43_v2, %v42_v1  ;;  %v41_v5 = vld [vmem:[%s292_s1 + $0x28] sm:$0xff]  ;;  %v38_v7 = vld [vmem:[%s292_s1 + $0x10] sm:$0xff]  ;;  %v39_v8 = vld [vmem:[%s292_s1 + $0x18] sm:$0xff] }
   0x3   :  { %v46_v6 = vpack.c.bf16 %v41_v5, %v40_v3  ;;  %v45_v9 = vpack.c.bf16 %v39_v8, %v38_v7  ;;  %v36_v10 = vld [vmem:[%s292_s1] sm:$0xff]  ;;  %v37_v11 = vld [vmem:[%s292_s1 + $0x8] sm:$0xff] }
   0x4   :  { %177 = vmatpush3.bf16.msra.mxu0 %v47_v4  ;;  %v44_v12 = vpack.c.bf16 %v37_v11, %v36_v10  ;;  %v33_v13 = vld [vmem:[%s293_s0] sm:$0xff]  ;;  %v34_v14 = vld [vmem:[%s293_s0 + $0x8] sm:$0xff] }
   0x5   :  { %178 = vmatprep.subr.bf16.mxu0 %v194_v0  ;;  %v35_v15 = vpack.c.bf16 %v34_v14, %v33_v13  ;;  %v168_v24 = vld [vmem:[%s294_s2] ss:$0 sm:$0xff]  ;;  %v113_v30 = vld [vmem:[%s295_s3 + $0x8] sm:$0xff] }
   0x6   :  { %v112_v26 = vld [vmem:[%s295_s3] sm:$0xff] }
   0x7   :  { %v169_v52 = vld [vmem:[%s296_s4] ss:$0 sm:$0xff] }
   0x8   :  { %179 = vmatpush3.bf16.msra.mxu0 %v46_v6  ;;  %v31_v16 = vld [vmem:[#allocation2] sm:$0xff] }
   0x9   :  { %180 = vmatprep.subr.bf16.mxu0 %v194_v0  ;;  %v32_v20 = vld [vmem:[#allocation2 + $0x8] sm:$0xff]  ;;  %v170_v54 = vld [vmem:[%s297_s5] ss:$0 sm:$0xff] }
   0xc   :  { %181 = vmatpush3.bf16.msra.mxu0 %v45_v9 }
   0xd   :  { %182 = vmatprep.subr.bf16.mxu0 %v194_v0 }
  0x10   :  { %183 = vmatpush3.bf16.msra.mxu0 %v44_v12 }
  0x13   :  { %185 = vmatmul.mubr.msk.bf16.vlgmr.msra.gmra.mxu0 %vm48_vm2, %v35_v15 }
  0xd3   :  { %v86_v17 = vpop.f32.mrf.mxu0 }
  0xd4   :  { %v93_v18 = vadd.f32 %v86_v17, %v31_v16 }
  0xd5   :  { %v186_v19 = vpop.f32.mrf.mxu0 }
  0xd6   :  { %96 = vst.msk [vmem:[#allocation2] sm:$0xff] %vm28_vm0, %v93_v18 }
  0xd7   :  { %v89_v21 = vpop.f32.mrf.mxu0 }
  0xd8   :  { %v94_v22 = vadd.f32 %v89_v21, %v32_v20 }
  0xd9   :  { %v187_v23 = vpop.f32.mrf.mxu0 }
  0xda   :  { %97 = vst.msk [vmem:[#allocation2 + $0x8] sm:$0xff] %vm28_vm0, %v94_v22 }
  0xdd   :  { %v101_v25 = vld [vmem:[#allocation2] sm:$0xff] }
  0xde   :  { %v110_v27 = vadd.f32 %v168_v24, %v101_v25 }
  0xe0   :  { %v114_v28 = vadd.f32 %v112_v26, %v110_v27 }
  0xe1   :  { %v102_v29 = vld [vmem:[#allocation2 + $0x8] sm:$0xff] }
  0xe2   :  { %v116_v31 = vsel %vm28_vm0, %v114_v28, 0.0  ;;  %v111_v32 = vadd.f32 %v168_v24, %v102_v29 }
  0xe3   :  { %117 = vadd.xlane.f32.xlu0 %v116_v31 }
  0xe4   :  { %v115_v33 = vadd.f32 %v113_v30, %v111_v32 }
  0xe6   :  { %v119_v34 = vsel %vm28_vm0, %v115_v33, 0.0 }
  0xe7   :  { %120 = vadd.xlane.f32.xlu0 %v119_v34 }
 0x16c   :  { %v118_v35 = vpop.xlane.xlu0 %117 }
 0x16d   :  { %v123_v36 = vmul.f32 0.03125, %v118_v35 }
 0x16f   :  { %v125_v37 = vsub.f32 %v114_v28, %v123_v36 }
 0x170   :  { %v121_v38 = vpop.xlane.xlu0 %120 }
 0x171   :  { %v124_v39 = vmul.f32 0.03125, %v121_v38  ;;  %v127_v40 = vmul.f32 %v125_v37, %v125_v37 }
 0x173   :  { %v126_v41 = vsub.f32 %v115_v33, %v124_v39  ;;  %v129_v42 = vsel %vm28_vm0, %v127_v40, 0.0 }
 0x174   :  { %130 = vadd.xlane.f32.xlu1 %v129_v42 }
 0x175   :  { %v128_v43 = vmul.f32 %v126_v41, %v126_v41 }
 0x177   :  { %v132_v44 = vsel %vm28_vm0, %v128_v43, 0.0 }
 0x178   :  { %133 = vadd.xlane.f32.xlu1 %v132_v44 }
 0x1fd   :  { %v131_v45 = vpop.xlane.xlu1 %130 }
 0x1fe   :  { %v135_v46 = vmul.f32 0.03125, %v131_v45 }
 0x200   :  { %v137_v47 = vadd.f32 1e-05, %v135_v46 }
 0x201   :  { %v134_v48 = vpop.xlane.xlu1 %133 }
 0x202   :  { %190 = vrsqrt.f32 %v137_v47  ;;  %v136_v49 = vmul.f32 0.03125, %v134_v48 }
 0x204   :  { %v138_v50 = vadd.f32 1e-05, %v136_v49 }
 0x206   :  { %192 = vrsqrt.f32 %v138_v50 }
 0x20f   :  { %v191_v51 = vpop.eup %190 }
 0x210   :  { %v141_v53 = vmul.f32 %v191_v51, %v125_v37 }
 0x212   :  { %v150_v55 = vmul.f32 %v169_v52, %v141_v53 }
 0x213   :  { %v193_v56 = vpop.eup %192 }
 0x214   :  { %v159_v57 = vadd.f32 %v170_v54, %v150_v55  ;;  %v142_v58 = vmul.f32 %v193_v56, %v126_v41 }
 0x216   :  { %161 = vst.msk [vmem:[%s298_s6] sm:$0xff] %vm28_vm0, %v159_v57  ;;  %v151_v59 = vmul.f32 %v169_v52, %v142_v58 }
 0x218   :  { %v160_v60 = vadd.f32 %v170_v54, %v151_v59 }
 0x21a   :  { %162 = vst.msk [vmem:[%s298_s6 + $0x8] sm:$0xff] %vm28_vm0, %v160_v60 }

// kernel: encoder_forward.19
= control target key start
LH: loop header
LB: loop body
LE: loop exit
PB: predicated region body
PF: predicated region fallthrough
CT: control target
= control target key end

     0   :  { %v232_v3 = vmov 0.0   ;;  %vm233_vm0 = vmmov 0   ;;  %vm29_vm1 = vcmask 261120   ;;  %s330_s0 = inlined_call_operand.vmem [shape: f32[16,64], index: 0, kind: input, shape index: {}]   ;;  %s331_s1 = inlined_call_operand.vmem [shape: f32[64,32], index: 1, kind: input, shape index: {}]   ;;  %s332_s2 = inlined_call_operand.vmem [shape: f32[1,32], index: 2, kind: input, shape index: {}]   ;;  %s333_s3 = inlined_call_operand.vmem [shape: f32[16,32], index: 3, kind: input, shape index: {}]   ;;  %s334_s4 = inlined_call_operand.vmem [shape: f32[1,32], index: 4, kind: input, shape index: {}]   ;;  %s335_s5 = inlined_call_operand.vmem [shape: f32[1,32], index: 5, kind: input, shape index: {}]   ;;  %s336_s6 = inlined_call_operand.hbm [shape: f32[16,32], index: 6, kind: output, shape index: {}]  }
   0x1   :  { %v43_v0 = vld [vmem:[%s331_s1 + $0x30] sm:$0xff]  ;;  %v44_v1 = vld [vmem:[%s331_s1 + $0x38] sm:$0xff]  ;;  %v41_v2 = vld [vmem:[%s331_s1 + $0x20] sm:$0xff]  ;;  %189 = vmatprep.subr.bf16.mxu0 %v232_v3  ;;  %197 = vmatprep.mubr.msk.bf16.mxu0 %vm233_vm0, %v232_v3  ;;  %30 = vst.msk [vmem:[#allocation2] sm:$0xff] %vm29_vm1, %v232_v3 }
   0x2   :  { %v48_v4 = vpack.c.bf16 %v44_v1, %v43_v0  ;;  %v42_v5 = vld [vmem:[%s331_s1 + $0x28] sm:$0xff]  ;;  %31 = vst.msk [vmem:[#allocation2 + $0x8] sm:$0xff] %vm29_vm1, %v232_v3 }
   0x3   :  { %v47_v6 = vpack.c.bf16 %v42_v5, %v41_v2 }
   0x4   :  { %190 = vmatpush3.bf16.msra.mxu0 %v48_v4 }
   0x5   :  { %11 = vsyncpa [#allocation4], 0  ;;  %191 = vmatprep.subr.bf16.mxu0 %v232_v3  ;;  %v39_v7 = vld [vmem:[%s331_s1 + $0x10] sm:$0xff]  ;;  %v40_v8 = vld [vmem:[%s331_s1 + $0x18] sm:$0xff]  ;;  %vm49_vm2 = vcmask 523264   ;;  %s234_s23 = smov [#allocation3]  }
   0x6   :  { %v46_v9 = vpack.c.bf16 %v40_v8, %v39_v7  ;;  %v37_v10 = vld [vmem:[%s331_s1] sm:$0xff]  ;;  %v38_v11 = vld [vmem:[%s331_s1 + $0x8] sm:$0xff]  ;;  %s169_s24 = sshll.u32 %s234_s23, 4  ;;  %s170_s24 = int_to_ptr.vmem [resolvable:$true] %s169_s24 }
   0x7   :  { %v45_v12 = vpack.c.bf16 %v38_v11, %v37_v10  ;;  %v34_v13 = vld [vmem:[%s330_s0] sm:$0xff]  ;;  %v35_v14 = vld [vmem:[%s330_s0 + $0x8] sm:$0xff]  ;;  %s210_s25 = scalar_lea.vmem %s170_s24, 256  ;;  %p215_p1 = scmp.lt.s32.totalorder %s170_s24, %s170_s24 }
   0x8   :  { %192 = vmatpush3.bf16.msra.mxu0 %v47_v6  ;;  %v36_v15 = vpack.c.bf16 %v35_v14, %v34_v13  ;;  %v32_v16 = vld [vmem:[#allocation2] sm:$0xff]  ;;  %v114_v30 = vld [vmem:[%s333_s3 + $0x8] sm:$0xff]  ;;  %p211_p0 = scmp.ne.s32.totalorder %s170_s24, %s210_s25  ;;  %p216_p2 = scmp.lt.s32.totalorder %s210_s25, %s210_s25 }
   0x9   :  { %193 = vmatprep.subr.bf16.mxu0 %v232_v3  ;;  %v33_v20 = vld [vmem:[#allocation2 + $0x8] sm:$0xff]  ;;  %v181_v24 = vld [vmem:[%s332_s2] ss:$0 sm:$0xff] }
   0xa   :  { %v113_v26 = vld [vmem:[%s333_s3] sm:$0xff]  ;;  %p217_p3 = por %p216_p2, %p215_p1 }
   0xb   :  { %v182_v52 = vld [vmem:[%s334_s4] ss:$0 sm:$0xff] }
   0xc   :  { %194 = vmatpush3.bf16.msra.mxu0 %v46_v9  ;;  %v183_v54 = vld [vmem:[%s335_s5] ss:$0 sm:$0xff]  ;;  %p218_p4 = pnand %p217_p3, %p211_p0 }
   0xd   :  { %195 = vmatprep.subr.bf16.mxu0 %v232_v3 }
  0x10   :  { %196 = vmatpush3.bf16.msra.mxu0 %v45_v12 }
  0x13   :  { %198 = vmatmul.mubr.msk.bf16.vlgmr.msra.gmra.mxu0 %vm49_vm2, %v36_v15 }
  0xd3   :  { %v87_v17 = vpop.f32.mrf.mxu0 }
  0xd4   :  { %v94_v18 = vadd.f32 %v87_v17, %v32_v16 }
  0xd5   :  { %v199_v19 = vpop.f32.mrf.mxu0 }
  0xd6   :  { %97 = vst.msk [vmem:[#allocation2] sm:$0xff] %vm29_vm1, %v94_v18 }
  0xd7   :  { %v90_v21 = vpop.f32.mrf.mxu0 }
  0xd8   :  { %v95_v22 = vadd.f32 %v90_v21, %v33_v20 }
  0xd9   :  { %v200_v23 = vpop.f32.mrf.mxu0 }
  0xda   :  { %98 = vst.msk [vmem:[#allocation2 + $0x8] sm:$0xff] %vm29_vm1, %v95_v22 }
  0xdd   :  { %v102_v25 = vld [vmem:[#allocation2] sm:$0xff] }
  0xde   :  { %v111_v27 = vadd.f32 %v181_v24, %v102_v25 }
  0xe0   :  { %v115_v28 = vadd.f32 %v113_v26, %v111_v27 }
  0xe1   :  { %v103_v29 = vld [vmem:[#allocation2 + $0x8] sm:$0xff] }
  0xe2   :  { %v117_v31 = vsel %vm29_vm1, %v115_v28, 0.0  ;;  %v112_v32 = vadd.f32 %v181_v24, %v103_v29 }
  0xe3   :  { %118 = vadd.xlane.f32.xlu0 %v117_v31 }
  0xe4   :  { %v116_v33 = vadd.f32 %v114_v30, %v112_v32 }
  0xe6   :  { %v120_v34 = vsel %vm29_vm1, %v116_v33, 0.0 }
  0xe7   :  { %121 = vadd.xlane.f32.xlu0 %v120_v34 }
 0x16c   :  { %v119_v35 = vpop.xlane.xlu0 %118 }
 0x16d   :  { %v124_v36 = vmul.f32 0.03125, %v119_v35 }
 0x16f   :  { %v126_v37 = vsub.f32 %v115_v28, %v124_v36 }
 0x170   :  { %v122_v38 = vpop.xlane.xlu0 %121 }
 0x171   :  { %v125_v39 = vmul.f32 0.03125, %v122_v38  ;;  %v128_v40 = vmul.f32 %v126_v37, %v126_v37 }
 0x173   :  { %v127_v41 = vsub.f32 %v116_v33, %v125_v39  ;;  %v130_v42 = vsel %vm29_vm1, %v128_v40, 0.0 }
 0x174   :  { %131 = vadd.xlane.f32.xlu1 %v130_v42 }
 0x175   :  { %v129_v43 = vmul.f32 %v127_v41, %v127_v41 }
 0x177   :  { %v133_v44 = vsel %vm29_vm1, %v129_v43, 0.0 }
 0x178   :  { %134 = vadd.xlane.f32.xlu1 %v133_v44 }
 0x1fd   :  { %v132_v45 = vpop.xlane.xlu1 %131 }
 0x1fe   :  { %v136_v46 = vmul.f32 0.03125, %v132_v45 }
 0x200   :  { %v138_v47 = vadd.f32 1e-05, %v136_v46 }
 0x201   :  { %v135_v48 = vpop.xlane.xlu1 %134 }
 0x202   :  { %206 = vrsqrt.f32 %v138_v47  ;;  %v137_v49 = vmul.f32 0.03125, %v135_v48 }
 0x204   :  { %v139_v50 = vadd.f32 1e-05, %v137_v49 }
 0x206   :  { %208 = vrsqrt.f32 %v139_v50 }
 0x20f   :  { %v207_v51 = vpop.eup %206 }
 0x210   :  { %v142_v53 = vmul.f32 %v207_v51, %v126_v37 }
 0x212   :  { %v151_v55 = vmul.f32 %v182_v52, %v142_v53 }
 0x213   :  { %v209_v56 = vpop.eup %208 }
 0x214   :  { %v143_v57 = vmul.f32 %v209_v56, %v127_v41  ;;  %v160_v58 = vadd.f32 %v183_v54, %v151_v55 }
 0x216   :  { %v152_v59 = vmul.f32 %v182_v52, %v143_v57  ;;  %162 = vst.msk [vmem:[#allocation3] sm:$0xff] %vm29_vm1, %v160_v58 }
 0x218   :  { %v161_v60 = vadd.f32 %v183_v54, %v152_v59 }
 0x21a   :  { %163 = vst.msk [vmem:[#allocation3 + $0x8] sm:$0xff] %vm29_vm1, %v161_v60 }
 0x21b   :  { %221 = shalt.err (!%p218_p4)
}
 0x21c   :  { %s235_s4 = smov 128   ;;  %s236_s5 = smov 8  }
 0x21d   :  { %175 = dma.vmem_to_hbm [thread:$0]  %s170_s24, 256, %s336_s6, [#allocation4], %s235_s4, %s235_s4, %s236_s5  }
 0x21e   :  { %230 = dma.done.wait [#allocation4], 256  }
 0x21f   :  { %231 = vsyncadd [#allocation4], 4294967040 }
 0x220   :  { %179 = vsyncpa [#allocation4], 1 }

</bundles_post_ra>
